<compile_context>
chip_gen: v7x
topology: tpu7x:2x2x1
jax: 0.10.0
libtpu: 0.0.40
codegen_flags: <defaults>
</compile_context>

<pallas_src>
import functools

import jax
import jax.numpy as jnp
import numpy as np
from jax import lax
from jax.experimental import pallas as pl
from jax.experimental.pallas import tpu as pltpu

# Raise the scoped VMEM limit above the 16/32 MiB defaults; kept <= v7x physical 64 MiB.
_VMEM_LIMIT_BYTES = 64 * 1024 * 1024


def _round_up(x, m):
    return ((x + m - 1) // m) * m


@functools.lru_cache(maxsize=None)
def _single_buffer_ok():
    """Probe (once) whether pipeline_mode=pl.Buffered(1) is supported on this install.
    Falls back to default double-buffering if not."""
    try:
        def _copy(x_ref, o_ref):
            o_ref[...] = x_ref[...]

        probe = pl.pallas_call(
            _copy,
            out_shape=jax.ShapeDtypeStruct((8, 128), jnp.float32),
            grid=(2,),
            in_specs=[pl.BlockSpec((8, 128), lambda i: (0, 0),
                                   pipeline_mode=pl.Buffered(1))],
            out_specs=pl.BlockSpec((8, 128), lambda i: (0, 0)),
        )
        jax.jit(probe).lower(jnp.zeros((8, 128), jnp.float32)).compile()
        return True
    except Exception:
        return False


def _resident_spec(block_shape, index_map):
    """BlockSpec for grid-invariant (resident) operands: single-buffered when supported,
    saving one full weight copy of VMEM per operand at production widths."""
    if _single_buffer_ok():
        return pl.BlockSpec(block_shape, index_map, pipeline_mode=pl.Buffered(1))
    return pl.BlockSpec(block_shape, index_map)


# ----------------------------------------------------------------------------
# Tiled linear kernel: out = x @ w_t + b.  Used only for the final output layer
# (the GRU input projection is fused into the recurrent kernel).
# ----------------------------------------------------------------------------
def _linear_kernel(x_ref, w_ref, b_ref, o_ref):
    w = w_ref[...]
    o_ref[...] = (jnp.dot(x_ref[...].astype(w.dtype), w,
                          preferred_element_type=jnp.float32)
                  + b_ref[...]).astype(o_ref.dtype)


def linear_pallas(x2d, w_t, b_row, *, tile_m=512, out_dtype=jnp.float32):
    """x2d: (M, K); w_t: (K, N) pre-transposed/padded; b_row: (1, N) f32 -> (M, N).
    The M-tile is chosen to divide M when possible so the activation is never
    copy-padded through HBM before the kernel."""
    M, K = x2d.shape
    N = w_t.shape[1]
    if M % 8 == 0:
        TM = min(tile_m, M)
        while M % TM != 0:                       # largest multiple of 8 <= tile_m dividing M
            TM -= 8
        Mp, xp = M, x2d
    else:                                        # rare fallback: pad the ragged tail
        TM = min(tile_m, _round_up(M, 8))
        Mp = _round_up(M, TM)
        xp = jnp.pad(x2d, ((0, Mp - M), (0, 0)))

    out = pl.pallas_call(
        _linear_kernel,
        out_shape=jax.ShapeDtypeStruct((Mp, N), out_dtype),
        grid_spec=pltpu.PrefetchScalarGridSpec(
            num_scalar_prefetch=0,
            grid=(Mp // TM,),
            in_specs=[pl.BlockSpec((TM, K), lambda i: (i, 0)),    # activation tile
                      _resident_spec((K, N), lambda i: (0, 0)),   # weights resident (1-buf)
                      _resident_spec((1, N), lambda i: (0, 0))],  # bias resident (1-buf)
            out_specs=pl.BlockSpec((TM, N), lambda i: (i, 0)),
        ),
        compiler_params=pltpu.CompilerParams(
            dimension_semantics=("parallel",),
            vmem_limit_bytes=_VMEM_LIMIT_BYTES),
    )(xp, w_t, b_row)
    return out if Mp == M else out[:M]


# ----------------------------------------------------------------------------
# Fused GRU layer kernel.  Grid = (batch blocks [parallel], sequence chunks
# [arbitrary]).  Each grid step: one big (chunk*BB, I)x(I, 3Hp) input-projection
# matmul into VMEM scratch, then a fori_loop over the chunk doing the (BB, Hp) x
# (Hp, 3Hp) recurrent matmul + gate math.  Hidden state carried in VMEM scratch.
# ----------------------------------------------------------------------------
def _gru_fused_kernel(x_ref, h0_ref, wih_ref, bih_ref, whh_ref, bhhn_ref,
                      y_ref, hfin_ref, h_scr, gi_scr, *, seq_len, chunk, unroll):
    sc = pl.program_id(1)                        # sequence-chunk axis (carries hidden state)
    BB, Hp = h_scr.shape
    Ip = x_ref.shape[-1]

    @pl.when(sc == 0)
    def _():
        h_scr[...] = h0_ref[...]

    wih = wih_ref[...]                           # (Ip, 3Hp) resident
    whh = whh_ref[...]                           # (Hp, 3Hp) resident
    bih = bih_ref[...]                           # (1, 3Hp)  (b_ih with b_hh r/z folded in)
    bhhn = bhhn_ref[...]                         # (1, Hp)   n-gate recurrent bias

    # Fused input projection for the WHOLE chunk: one MXU-filling matmul into VMEM.
    x2d = x_ref[...].reshape(chunk * BB, Ip)
    gi = jnp.dot(x2d.astype(wih.dtype), wih, preferred_element_type=jnp.float32) + bih
    gi_scr[...] = gi.reshape(chunk, BB, 3 * Hp)

    base = sc * chunk

    def step(t, h):
        gh = jnp.dot(h.astype(whh.dtype), whh, preferred_element_type=jnp.float32)
        gi_t = gi_scr[t].astype(jnp.float32)
        # Gates packed on 128-lane boundaries: [r | z | n].  Gate math stays f32.
        r = jax.nn.sigmoid(gi_t[:, 0:Hp] + gh[:, 0:Hp])
        z = jax.nn.sigmoid(gi_t[:, Hp:2 * Hp] + gh[:, Hp:2 * Hp])
        n = jnp.tanh(gi_t[:, 2 * Hp:3 * Hp] + r * (gh[:, 2 * Hp:3 * Hp] + bhhn))
        h_new = n + z * (h - n)                  # == (1-z)*n + z*h, one fewer VALU op
        # Freeze h on padded timesteps so the carried state (and hfin) stays correct.
        h_next = jnp.where(base + t < seq_len, h_new, h)
        y_ref[t] = h_next.astype(y_ref.dtype)
        return h_next

    h_last = lax.fori_loop(0, chunk, step, h_scr[...], unroll=unroll)
    h_scr[...] = h_last

    @pl.when(sc == pl.num_programs(1) - 1)
    def _():
        hfin_ref[...] = h_last.astype(hfin_ref.dtype)


def gru_layer(x, h0, w_ih_t, b_ih, w_hh_t, b_hhn, *, seq_len, chunk,
              batch_block=None, stream_dtype=jnp.float32, unroll=8):
    """x: (Sp, Bp, Ip) layer input (time-major, padded); h0: (Bp, Hp).
    Returns (y: (Sp, Bp, Hp) in stream_dtype, hfin: (Bp, Hp) f32 = hidden at step seq_len-1).

    batch_block=None keeps the full padded batch per block (recommended on v5e/v6e: the
    recurrence is W_hh-stream bound and splitting re-streams the weights).  On v7x pass
    batch_block=Bp//2 for batches >= 16 so the 'parallel' axis spans both TensorCores."""
    Sp, Bp, Ip = x.shape
    Hp = w_hh_t.shape[0]
    BB = Bp if batch_block is None else max(8, min(batch_block, Bp))
    assert Bp % BB == 0 and Sp % chunk == 0
    nb, ns = Bp // BB, Sp // chunk

    kernel = functools.partial(_gru_fused_kernel, seq_len=seq_len, chunk=chunk,
                               unroll=min(unroll, chunk))
    return pl.pallas_call(
        kernel,
        out_shape=(jax.ShapeDtypeStruct((Sp, Bp, Hp), stream_dtype),
                   jax.ShapeDtypeStruct((Bp, Hp), jnp.float32)),
        grid_spec=pltpu.PrefetchScalarGridSpec(
            num_scalar_prefetch=0,
            grid=(nb, ns),                                                 # (batch blk, seq chunk)
            in_specs=[
                pl.BlockSpec((chunk, BB, Ip), lambda b, s: (s, b, 0)),     # x chunk
                pl.BlockSpec((BB, Hp), lambda b, s: (b, 0)),               # h0
                _resident_spec((Ip, 3 * Hp), lambda b, s: (0, 0)),         # W_ih^T resident
                _resident_spec((1, 3 * Hp), lambda b, s: (0, 0)),          # b_ih (+ b_hh r/z)
                _resident_spec((Hp, 3 * Hp), lambda b, s: (0, 0)),         # W_hh^T resident
                _resident_spec((1, Hp), lambda b, s: (0, 0)),              # b_hh n-gate
            ],
            out_specs=[
                pl.BlockSpec((chunk, BB, Hp), lambda b, s: (s, b, 0)),     # hidden sequence
                pl.BlockSpec((BB, Hp), lambda b, s: (b, 0)),               # final hidden
            ],
            scratch_shapes=[pltpu.VMEM((BB, Hp), jnp.float32),             # carried h
                            pltpu.VMEM((chunk, BB, 3 * Hp), jnp.float32)], # per-chunk gi
        ),
        compiler_params=pltpu.CompilerParams(
            dimension_semantics=("parallel", "arbitrary"),
            vmem_limit_bytes=_VMEM_LIMIT_BYTES),
    )(x, h0, w_ih_t, b_ih, w_hh_t, b_hhn)


# ----------------------------------------------------------------------------
# Parameter init (raw PyTorch layout) and one-time packing (transpose + pad).
# ----------------------------------------------------------------------------
def init_params(key, *, n_letters, n_ext, char_emb_size, ext_emb_size,
                nhid, num_layers):
    in_dim0 = char_emb_size + ext_emb_size
    keys = jax.random.split(key, 4 + 4 * num_layers)
    ki = iter(keys)
    params = {
        "ext_emb": jax.random.normal(next(ki), (n_ext, ext_emb_size), jnp.float32),
        "char_emb": jax.random.normal(next(ki), (n_letters, char_emb_size), jnp.float32),
        "layers": [],
    }
    for l in range(num_layers):
        in_dim = in_dim0 if l == 0 else nhid
        bound = 1.0 / np.sqrt(nhid)
        params["layers"].append({
            "w_ih": jax.random.uniform(next(ki), (3 * nhid, in_dim), jnp.float32, -bound, bound),
            "w_hh": jax.random.uniform(next(ki), (3 * nhid, nhid), jnp.float32, -bound, bound),
            "b_ih": jax.random.uniform(next(ki), (3 * nhid,), jnp.float32, -bound, bound),
            "b_hh": jax.random.uniform(next(ki), (3 * nhid,), jnp.float32, -bound, bound),
        })
    bound = 1.0 / np.sqrt(nhid)
    params["w_out"] = jax.random.uniform(next(ki), (n_letters, nhid), jnp.float32, -bound, bound)
    params["b_out"] = jax.random.uniform(next(ki), (n_letters,), jnp.float32, -bound, bound)
    return params


def prepare_params(raw, *, compute_dtype=jnp.float32):
    """Pack raw params once: transpose, pad hidden/gate/input axes to 128-lane boundaries,
    fold b_hh's r/z components into b_ih, optionally cast weights to bf16 (compute_dtype,
    recommended on v6e/v7x).  Biases stay f32."""
    nhid = raw["layers"][0]["w_hh"].shape[1]
    n_letters = raw["w_out"].shape[0]
    Hp = _round_up(nhid, 128)
    Np = _round_up(n_letters, 128)

    def pack_w(w, in_pad):      # (3H, in) -> (in_pad, 3Hp); gates at 128-lane offsets
        w = np.asarray(w, np.float32)
        out = np.zeros((in_pad, 3 * Hp), np.float32)
        for g in range(3):
            out[:w.shape[1], g * Hp:g * Hp + nhid] = w[g * nhid:(g + 1) * nhid, :].T
        return jnp.asarray(out, compute_dtype)

    layers = []
    for l, lp in enumerate(raw["layers"]):
        in_dim = lp["w_ih"].shape[1]
        in_pad = _round_up(in_dim, 128) if l == 0 else Hp      # lane-aligned K for layer 0
        b_ih = np.asarray(lp["b_ih"], np.float32)
        b_hh = np.asarray(lp["b_hh"], np.float32)
        # Fold b_hh's r/z components into b_ih; only the n-gate recurrent bias stays
        # separate because it is scaled by r inside the tanh.
        b_ih_comb = np.zeros((1, 3 * Hp), np.float32)
        for g in range(3):
            val = b_ih[g * nhid:(g + 1) * nhid]
            if g < 2:
                val = val + b_hh[g * nhid:(g + 1) * nhid]
            b_ih_comb[0, g * Hp:g * Hp + nhid] = val
        b_hhn = np.zeros((1, Hp), np.float32)
        b_hhn[0, :nhid] = b_hh[2 * nhid:3 * nhid]
        layers.append({
            "w_ih_t": pack_w(lp["w_ih"], in_pad),
            "w_hh_t": pack_w(lp["w_hh"], Hp),
            "b_ih": jnp.asarray(b_ih_comb),
            "b_hhn": jnp.asarray(b_hhn),
        })

    w_out = np.asarray(raw["w_out"], np.float32)               # (n_letters, nhid)
    w_out_t = np.zeros((Hp, Np), np.float32)
    w_out_t[:nhid, :n_letters] = w_out.T
    b_out = np.zeros((1, Np), np.float32)
    b_out[0, :n_letters] = np.asarray(raw["b_out"], np.float32)

    return {
        "ext_emb": raw["ext_emb"],
        "char_emb": raw["char_emb"],
        "layers": layers,
        "w_out_t": jnp.asarray(w_out_t, compute_dtype),
        "b_out": jnp.asarray(b_out),
    }


# ----------------------------------------------------------------------------
# Forward (mirrors GRUCharModel.forward semantics; batch_first in/out).
# ----------------------------------------------------------------------------
def gru_char_forward(params, ext, inputs, hidden, *, chunk=16, batch_block=None,
                     stream_dtype=jnp.float32):
    """ext: (1,) int32; inputs: (B, S) int32; hidden: (num_layers, B, nhid) f32.
    Returns (out, hidden_out): out (B, S, n_letters), hidden_out (num_layers, B, nhid).
    For production on v6e/v7x use prepare_params(compute_dtype=bf16) and
    stream_dtype=bf16 (halves weight VMEM and inter-layer HBM traffic)."""
    B, S = inputs.shape
    nhid = hidden.shape[-1]
    Hp = params["layers"][0]["w_hh_t"].shape[0]
    n_letters = params["char_emb"].shape[0]
    Bp = _round_up(B, 8)
    T = min(chunk, S)
    Sp = _round_up(S, T)

    # Embedding gathers, built directly time-major (only the tiny int32 index array is
    # transposed).  Plain-JAX glue.
    ee = params["ext_emb"].shape[-1]
    ext_vec = params["ext_emb"][ext]                                  # (1, Ee)
    ext_out = jnp.broadcast_to(ext_vec[None, :, :], (S, B, ee))
    char_out = params["char_emb"][inputs.T]                           # (S, B, Ce)
    x = jnp.concatenate([ext_out, char_out], axis=-1)                 # (S, B, I0)
    I0p = params["layers"][0]["w_ih_t"].shape[0]                      # lane-aligned layer-0 K
    x = jnp.pad(x, ((0, Sp - S), (0, Bp - B), (0, I0p - x.shape[-1])))
    x = x.astype(stream_dtype)

    h0 = jnp.pad(hidden.astype(jnp.float32),
                 ((0, 0), (0, Bp - B), (0, Hp - nhid)))               # (L, Bp, Hp)

    # TODO(synk): bidirectional GRU / inter-layer dropout not implemented
    # (assumes bidirectional=False, dropout=0.0 as in the reference eval config).
    y = x
    h_finals = []
    for l, lp in enumerate(params["layers"]):
        y, hfin = gru_layer(y, h0[l], lp["w_ih_t"], lp["b_ih"], lp["w_hh_t"], lp["b_hhn"],
                            seq_len=S, chunk=T, batch_block=batch_block,
                            stream_dtype=stream_dtype)
        h_finals.append(hfin)

    out = linear_pallas(y.reshape(Sp * Bp, Hp), params["w_out_t"], params["b_out"])
    out = out.reshape(Sp, Bp, -1)[:S, :B, :n_letters]
    out = jnp.transpose(out, (1, 0, 2))            # back to batch_first at model boundary
    hidden_out = jnp.stack(h_finals, axis=0)[:, :B, :nhid]
    return out, hidden_out


# ----------------------------------------------------------------------------
# Pure-JAX reference (lax.scan over raw PyTorch-layout params) for verification.
# ----------------------------------------------------------------------------
def _ref_forward(raw, ext, inputs, hidden):
    B, S = inputs.shape
    ext_emb = raw["ext_emb"][ext]
    ext_out = jnp.broadcast_to(ext_emb[:, None, :], (B, S, ext_emb.shape[-1]))
    char_out = raw["char_emb"][inputs]
    x = jnp.concatenate([ext_out, char_out], axis=2)     # (B, S, I)

    h_finals = []
    layer_in = x
    H = hidden.shape[-1]
    for l, lp in enumerate(raw["layers"]):
        def step(h, x_t, lp=lp, H=H):
            gi = x_t @ lp["w_ih"].T + lp["b_ih"]
            gh = h @ lp["w_hh"].T + lp["b_hh"]
            r = jax.nn.sigmoid(gi[:, :H] + gh[:, :H])
            z = jax.nn.sigmoid(gi[:, H:2 * H] + gh[:, H:2 * H])
            n = jnp.tanh(gi[:, 2 * H:] + r * gh[:, 2 * H:])
            h_new = (1.0 - z) * n + z * h
            return h_new, h_new

        hfin, ys = jax.lax.scan(step, hidden[l], jnp.transpose(layer_in, (1, 0, 2)))
        layer_in = jnp.transpose(ys, (1, 0, 2))
        h_finals.append(hfin)

    out = layer_in @ raw["w_out"].T + raw["b_out"]
    return out, jnp.stack(h_finals, axis=0)


if __name__ == "__main__":
    # Small config consistent with the module's __init__.
    n_letters = 64
    n_ext = 4
    char_emb_size = 16
    ext_emb_size = 8
    nhid = 32
    num_layers = 2
    batch, seq_len = 2, 8

    key = jax.random.PRNGKey(0)
    kp, kx, ke = jax.random.split(key, 3)
    raw = init_params(kp, n_letters=n_letters, n_ext=n_ext,
                      char_emb_size=char_emb_size, ext_emb_size=ext_emb_size,
                      nhid=nhid, num_layers=num_layers)
    # compute_dtype=jnp.bfloat16 (and stream_dtype=bf16 below) is recommended for
    # production on v6e/v7x; f32 here keeps the correctness check tight.
    params = prepare_params(raw, compute_dtype=jnp.float32)

    inputs = jax.random.randint(kx, (batch, seq_len), 0, n_letters, dtype=jnp.int32)
    ext = jax.random.randint(ke, (1,), 0, n_ext, dtype=jnp.int32)
    hidden = jnp.zeros((num_layers, batch, nhid), jnp.float32)   # hid_init == 'zeros'

    _single_buffer_ok()   # run the Buffered(1) capability probe outside of jit tracing

    fwd = jax.jit(gru_char_forward)
    out, h_out = fwd(params, ext, inputs, hidden)
    out = jax.block_until_ready(out)
    h_out = jax.block_until_ready(h_out)

    # Sanity check against pure-JAX reference.
    ref_out, ref_h = _ref_forward(raw, ext, inputs, hidden)
    np.testing.assert_allclose(np.asarray(out), np.asarray(ref_out), rtol=1e-4, atol=1e-4)
    np.testing.assert_allclose(np.asarray(h_out), np.asarray(ref_h), rtol=1e-4, atol=1e-4)

    assert out.shape == (batch, seq_len, n_letters)
    assert h_out.shape == (num_layers, batch, nhid)
    print("KERNEL_OK")
</pallas_src>

<mosaic_0001>
module attributes {stable_mosaic.version = 11 : i64} {
  func.func @_linear_kernel(%arg0: i32, %arg1: memref<64x128xf32, #tpu.memory_space<vmem>>, %arg2: memref<128x128xf32, #tpu.memory_space<vmem>>, %arg3: memref<1x128xf32, #tpu.memory_space<vmem>>, %arg4: memref<64x128xf32, #tpu.memory_space<vmem>>) attributes {dimension_semantics = [#tpu.dimension_semantics<parallel>], iteration_bounds = array<i64: 1>, scalar_prefetch = 0 : i64, scratch_operands = 0 : i64, tpu.core_type = #tpu.core_type<tc>, window_params = [{transform_indices = @transform_0, window_bounds = array<i64: 64, 128>}, {pipeline_mode = #tpu.pipeline_mode<synchronous>, transform_indices = @transform_1, window_bounds = array<i64: 128, 128>}, {pipeline_mode = #tpu.pipeline_mode<synchronous>, transform_indices = @transform_2, window_bounds = array<i64: 1, 128>}, {transform_indices = @transform_3, window_bounds = array<i64: 64, 128>}]} {
    %c0 = arith.constant 0 : index
    %c0_0 = arith.constant 0 : index
    %0 = vector.load %arg2[%c0, %c0_0] : memref<128x128xf32, #tpu.memory_space<vmem>>, vector<128x128xf32>
    %c0_1 = arith.constant 0 : index
    %c0_2 = arith.constant 0 : index
    %1 = vector.load %arg1[%c0_1, %c0_2] : memref<64x128xf32, #tpu.memory_space<vmem>>, vector<64x128xf32>
    %cst = arith.constant dense<0.000000e+00> : vector<64x128xf32>
    %2 = tpu.matmul %1, %0, %cst {dimension_numbers = #tpu.dot_dimension_numbers<[1], [0], [0], [1], [0, 0, 1, 1], [], []>} : vector<64x128xf32>, vector<128x128xf32>, vector<64x128xf32> -> vector<64x128xf32>
    %c0_3 = arith.constant 0 : index
    %c0_4 = arith.constant 0 : index
    %3 = vector.load %arg3[%c0_3, %c0_4] : memref<1x128xf32, #tpu.memory_space<vmem>>, vector<1x128xf32>
    %4 = vector.broadcast %3 : vector<1x128xf32> to vector<64x128xf32>
    %5 = arith.addf %2, %4 : vector<64x128xf32>
    %c0_5 = arith.constant 0 : index
    %c0_6 = arith.constant 0 : index
    %6 = vector.load %arg4[%c0_5, %c0_6] : memref<64x128xf32, #tpu.memory_space<vmem>>, vector<64x128xf32>
    tpu.vector_store %arg4[%c0_5, %c0_6], %5 {strides = array<i32>} : memref<64x128xf32, #tpu.memory_space<vmem>>, vector<64x128xf32>,
    return
  }
  func.func @transform_0(%arg0: i32) -> (i32, i32) {
    %c0_i32 = arith.constant 0 : i32
    %c0_i32_0 = arith.constant 0 : i32
    return %arg0, %c0_i32 : i32, i32
  }
  func.func @transform_1(%arg0: i32) -> (i32, i32) {
    %c0_i32 = arith.constant 0 : i32
    %c0_i32_0 = arith.constant 0 : i32
    %c0_i32_1 = arith.constant 0 : i32
    return %c0_i32, %c0_i32_0 : i32, i32
  }
  func.func @transform_2(%arg0: i32) -> (i32, i32) {
    %c0_i32 = arith.constant 0 : i32
    %c0_i32_0 = arith.constant 0 : i32
    %c0_i32_1 = arith.constant 0 : i32
    return %c0_i32, %c0_i32_0 : i32, i32
  }
  func.func @transform_3(%arg0: i32) -> (i32, i32) {
    %c0_i32 = arith.constant 0 : i32
    %c0_i32_0 = arith.constant 0 : i32
    return %arg0, %c0_i32 : i32, i32
  }
}

module attributes {stable_mosaic.version = 11 : i64} {
  func.func @_gru_fused_kernel(%arg0: i32, %arg1: i32, %arg2: memref<8x8x128xf32, #tpu.memory_space<vmem>>, %arg3: memref<8x128xf32, #tpu.memory_space<vmem>>, %arg4: memref<128x384xf32, #tpu.memory_space<vmem>>, %arg5: memref<1x384xf32, #tpu.memory_space<vmem>>, %arg6: memref<128x384xf32, #tpu.memory_space<vmem>>, %arg7: memref<1x128xf32, #tpu.memory_space<vmem>>, %arg8: memref<8x8x128xf32, #tpu.memory_space<vmem>>, %arg9: memref<8x128xf32, #tpu.memory_space<vmem>>, %arg10: memref<8x128xf32, #tpu.memory_space<vmem>>, %arg11: memref<8x8x384xf32, #tpu.memory_space<vmem>>) attributes {dimension_semantics = [#tpu.dimension_semantics<parallel>, #tpu.dimension_semantics<arbitrary>], iteration_bounds = array<i64: 1, 1>, scalar_prefetch = 0 : i64, scratch_operands = 2 : i64, tpu.core_type = #tpu.core_type<tc>, window_params = [{transform_indices = @transform_0, window_bounds = array<i64: 8, 8, 128>}, {transform_indices = @transform_1, window_bounds = array<i64: 8, 128>}, {pipeline_mode = #tpu.pipeline_mode<synchronous>, transform_indices = @transform_2, window_bounds = array<i64: 128, 384>}, {pipeline_mode = #tpu.pipeline_mode<synchronous>, transform_indices = @transform_3, window_bounds = array<i64: 1, 384>}, {pipeline_mode = #tpu.pipeline_mode<synchronous>, transform_indices = @transform_4, window_bounds = array<i64: 128, 384>}, {pipeline_mode = #tpu.pipeline_mode<synchronous>, transform_indices = @transform_5, window_bounds = array<i64: 1, 128>}, {transform_indices = @transform_6, window_bounds = array<i64: 8, 8, 128>}, {transform_indices = @transform_7, window_bounds = array<i64: 8, 128>}]} {
    %c0_i32 = arith.constant 0 : i32
    %0 = arith.cmpi eq, %arg1, %c0_i32 : i32
    %1 = arith.extui %0 : i1 to i32
    %c0_i32_0 = arith.constant 0 : i32
    %2 = arith.cmpi ne, %1, %c0_i32_0 : i32
    scf.if %2 {
      %c0_86 = arith.constant 0 : index
      %c0_87 = arith.constant 0 : index
      %316 = vector.load %arg3[%c0_86, %c0_87] : memref<8x128xf32, #tpu.memory_space<vmem>>, vector<8x128xf32>
      %c0_88 = arith.constant 0 : index
      %c0_89 = arith.constant 0 : index
      %317 = vector.load %arg10[%c0_88, %c0_89] : memref<8x128xf32, #tpu.memory_space<vmem>>, vector<8x128xf32>
      tpu.vector_store %arg10[%c0_88, %c0_89], %316 {strides = array<i32>} : memref<8x128xf32, #tpu.memory_space<vmem>>, vector<8x128xf32>,
    } else {
    }
    %c0 = arith.constant 0 : index
    %c0_1 = arith.constant 0 : index
    %3 = vector.load %arg4[%c0, %c0_1] : memref<128x384xf32, #tpu.memory_space<vmem>>, vector<128x384xf32>
    %c0_2 = arith.constant 0 : index
    %c0_3 = arith.constant 0 : index
    %4 = vector.load %arg6[%c0_2, %c0_3] : memref<128x384xf32, #tpu.memory_space<vmem>>, vector<128x384xf32>
    %c0_4 = arith.constant 0 : index
    %c0_5 = arith.constant 0 : index
    %5 = vector.load %arg5[%c0_4, %c0_5] : memref<1x384xf32, #tpu.memory_space<vmem>>, vector<1x384xf32>
    %c0_6 = arith.constant 0 : index
    %c0_7 = arith.constant 0 : index
    %6 = vector.load %arg7[%c0_6, %c0_7] : memref<1x128xf32, #tpu.memory_space<vmem>>, vector<1x128xf32>
    %c0_8 = arith.constant 0 : index
    %c0_9 = arith.constant 0 : index
    %c0_10 = arith.constant 0 : index
    %7 = vector.load %arg2[%c0_8, %c0_9, %c0_10] : memref<8x8x128xf32, #tpu.memory_space<vmem>>, vector<8x8x128xf32>
    %8 = vector.shape_cast %7 : vector<8x8x128xf32> to vector<64x128xf32>
    %cst = arith.constant dense<0.000000e+00> : vector<64x384xf32>
    %9 = tpu.matmul %8, %3, %cst {dimension_numbers = #tpu.dot_dimension_numbers<[1], [0], [0], [1], [0, 0, 1, 1], [], []>} : vector<64x128xf32>, vector<128x384xf32>, vector<64x384xf32> -> vector<64x384xf32>
    %10 = vector.broadcast %5 : vector<1x384xf32> to vector<64x384xf32>
    %11 = arith.addf %9, %10 : vector<64x384xf32>
    %12 = vector.shape_cast %11 : vector<64x384xf32> to vector<8x8x384xf32>
    %c0_11 = arith.constant 0 : index
    %c0_12 = arith.constant 0 : index
    %c0_13 = arith.constant 0 : index
    %13 = vector.load %arg11[%c0_11, %c0_12, %c0_13] : memref<8x8x384xf32, #tpu.memory_space<vmem>>, vector<8x8x384xf32>
    tpu.vector_store %arg11[%c0_11, %c0_12, %c0_13], %12 {strides = array<i32>} : memref<8x8x384xf32, #tpu.memory_space<vmem>>, vector<8x8x384xf32>,
    %c8_i32 = arith.constant 8 : i32
    %14 = arith.muli %arg1, %c8_i32 : i32
    %c0_14 = arith.constant 0 : index
    %c0_15 = arith.constant 0 : index
    %15 = vector.load %arg10[%c0_14, %c0_15] : memref<8x128xf32, #tpu.memory_space<vmem>>, vector<8x128xf32>
    %c0_i32_16 = arith.constant 0 : i32
    %cst_17 = arith.constant dense<0.000000e+00> : vector<8x384xf32>
    %16 = tpu.matmul %15, %4, %cst_17 {dimension_numbers = #tpu.dot_dimension_numbers<[1], [0], [0], [1], [0, 0, 1, 1], [], []>} : vector<8x128xf32>, vector<128x384xf32>, vector<8x384xf32> -> vector<8x384xf32>
    %17 = arith.index_cast %c0_i32_16 : i32 to index
    %c0_18 = arith.constant 0 : index
    %c0_19 = arith.constant 0 : index
    %18 = vector.load %arg11[%17, %c0_18, %c0_19] : memref<8x8x384xf32, #tpu.memory_space<vmem>>, vector<1x8x384xf32>
    %19 = vector.shape_cast %18 : vector<1x8x384xf32> to vector<8x384xf32>
    %20 = vector.extract_strided_slice %19 {offsets = [0, 0], sizes = [8, 128], strides = [1, 1]} : vector<8x384xf32> to vector<8x128xf32>
    %21 = vector.extract_strided_slice %16 {offsets = [0, 0], sizes = [8, 128], strides = [1, 1]} : vector<8x384xf32> to vector<8x128xf32>
    %22 = arith.addf %20, %21 : vector<8x128xf32>
    %23 = arith.negf %22 : vector<8x128xf32>
    %24 = math.exp %23 : vector<8x128xf32>
    %cst_20 = arith.constant 1.000000e+00 : f32
    %25 = vector.broadcast %cst_20 : f32 to vector<8x128xf32>
    %26 = arith.addf %25, %24 : vector<8x128xf32>
    %27 = arith.divf %25, %26 : vector<8x128xf32>
    %28 = vector.extract_strided_slice %19 {offsets = [0, 128], sizes = [8, 128], strides = [1, 1]} : vector<8x384xf32> to vector<8x128xf32>
    %29 = vector.extract_strided_slice %16 {offsets = [0, 128], sizes = [8, 128], strides = [1, 1]} : vector<8x384xf32> to vector<8x128xf32>
    %30 = arith.addf %28, %29 : vector<8x128xf32>
    %31 = arith.negf %30 : vector<8x128xf32>
    %32 = math.exp %31 : vector<8x128xf32>
    %cst_21 = arith.constant 1.000000e+00 : f32
    %33 = vector.broadcast %cst_21 : f32 to vector<8x128xf32>
    %34 = arith.addf %33, %32 : vector<8x128xf32>
    %35 = arith.divf %33, %34 : vector<8x128xf32>
    %36 = vector.extract_strided_slice %19 {offsets = [0, 256], sizes = [8, 128], strides = [1, 1]} : vector<8x384xf32> to vector<8x128xf32>
    %37 = vector.extract_strided_slice %16 {offsets = [0, 256], sizes = [8, 128], strides = [1, 1]} : vector<8x384xf32> to vector<8x128xf32>
    %38 = vector.broadcast %6 : vector<1x128xf32> to vector<8x128xf32>
    %39 = arith.addf %37, %38 : vector<8x128xf32>
    %40 = arith.mulf %27, %39 : vector<8x128xf32>
    %41 = arith.addf %36, %40 : vector<8x128xf32>
    %42 = math.tanh %41 : vector<8x128xf32>
    %43 = arith.subf %15, %42 : vector<8x128xf32>
    %44 = arith.mulf %35, %43 : vector<8x128xf32>
    %45 = arith.addf %42, %44 : vector<8x128xf32>
    %46 = arith.addi %14, %c0_i32_16 : i32
    %c8_i32_22 = arith.constant 8 : i32
    %47 = arith.cmpi slt, %46, %c8_i32_22 : i32
    %48 = arith.select %47, %45, %15 : vector<8x128xf32>
    %49 = arith.index_cast %c0_i32_16 : i32 to index
    %c0_23 = arith.constant 0 : index
    %c0_24 = arith.constant 0 : index
    %50 = vector.load %arg8[%49, %c0_23, %c0_24] : memref<8x8x128xf32, #tpu.memory_space<vmem>>, vector<1x8x128xf32>
    %51 = vector.shape_cast %50 : vector<1x8x128xf32> to vector<8x128xf32>
    %52 = vector.shape_cast %48 : vector<8x128xf32> to vector<1x8x128xf32>
    tpu.vector_store %arg8[%49, %c0_23, %c0_24], %52 {strides = array<i32>} : memref<8x8x128xf32, #tpu.memory_space<vmem>>, vector<1x8x128xf32>,
    %c1_i32 = arith.constant 1 : i32
    %cst_25 = arith.constant dense<0.000000e+00> : vector<8x384xf32>
    %53 = tpu.matmul %48, %4, %cst_25 {dimension_numbers = #tpu.dot_dimension_numbers<[1], [0], [0], [1], [0, 0, 1, 1], [], []>} : vector<8x128xf32>, vector<128x384xf32>, vector<8x384xf32> -> vector<8x384xf32>
    %54 = arith.index_cast %c1_i32 : i32 to index
    %c0_26 = arith.constant 0 : index
    %c0_27 = arith.constant 0 : index
    %55 = vector.load %arg11[%54, %c0_26, %c0_27] : memref<8x8x384xf32, #tpu.memory_space<vmem>>, vector<1x8x384xf32>
    %56 = vector.shape_cast %55 : vector<1x8x384xf32> to vector<8x384xf32>
    %57 = vector.extract_strided_slice %56 {offsets = [0, 0], sizes = [8, 128], strides = [1, 1]} : vector<8x384xf32> to vector<8x128xf32>
    %58 = vector.extract_strided_slice %53 {offsets = [0, 0], sizes = [8, 128], strides = [1, 1]} : vector<8x384xf32> to vector<8x128xf32>
    %59 = arith.addf %57, %58 : vector<8x128xf32>
    %60 = arith.negf %59 : vector<8x128xf32>
    %61 = math.exp %60 : vector<8x128xf32>
    %cst_28 = arith.constant 1.000000e+00 : f32
    %62 = vector.broadcast %cst_28 : f32 to vector<8x128xf32>
    %63 = arith.addf %62, %61 : vector<8x128xf32>
    %64 = arith.divf %62, %63 : vector<8x128xf32>
    %65 = vector.extract_strided_slice %56 {offsets = [0, 128], sizes = [8, 128], strides = [1, 1]} : vector<8x384xf32> to vector<8x128xf32>
    %66 = vector.extract_strided_slice %53 {offsets = [0, 128], sizes = [8, 128], strides = [1, 1]} : vector<8x384xf32> to vector<8x128xf32>
    %67 = arith.addf %65, %66 : vector<8x128xf32>
    %68 = arith.negf %67 : vector<8x128xf32>
    %69 = math.exp %68 : vector<8x128xf32>
    %cst_29 = arith.constant 1.000000e+00 : f32
    %70 = vector.broadcast %cst_29 : f32 to vector<8x128xf32>
    %71 = arith.addf %70, %69 : vector<8x128xf32>
    %72 = arith.divf %70, %71 : vector<8x128xf32>
    %73 = vector.extract_strided_slice %56 {offsets = [0, 256], sizes = [8, 128], strides = [1, 1]} : vector<8x384xf32> to vector<8x128xf32>
    %74 = vector.extract_strided_slice %53 {offsets = [0, 256], sizes = [8, 128], strides = [1, 1]} : vector<8x384xf32> to vector<8x128xf32>
    %75 = vector.broadcast %6 : vector<1x128xf32> to vector<8x128xf32>
    %76 = arith.addf %74, %75 : vector<8x128xf32>
    %77 = arith.mulf %64, %76 : vector<8x128xf32>
    %78 = arith.addf %73, %77 : vector<8x128xf32>
    %79 = math.tanh %78 : vector<8x128xf32>
    %80 = arith.subf %48, %79 : vector<8x128xf32>
    %81 = arith.mulf %72, %80 : vector<8x128xf32>
    %82 = arith.addf %79, %81 : vector<8x128xf32>
    %83 = arith.addi %14, %c1_i32 : i32
    %c8_i32_30 = arith.constant 8 : i32
    %84 = arith.cmpi slt, %83, %c8_i32_30 : i32
    %85 = arith.select %84, %82, %48 : vector<8x128xf32>
    %86 = arith.index_cast %c1_i32 : i32 to index
    %c0_31 = arith.constant 0 : index
    %c0_32 = arith.constant 0 : index
    %87 = vector.load %arg8[%86, %c0_31, %c0_32] : memref<8x8x128xf32, #tpu.memory_space<vmem>>, vector<1x8x128xf32>
    %88 = vector.shape_cast %87 : vector<1x8x128xf32> to vector<8x128xf32>
    %89 = vector.shape_cast %85 : vector<8x128xf32> to vector<1x8x128xf32>
    tpu.vector_store %arg8[%86, %c0_31, %c0_32], %89 {strides = array<i32>} : memref<8x8x128xf32, #tpu.memory_space<vmem>>, vector<1x8x128xf32>,
    %c2_i32 = arith.constant 2 : i32
    %cst_33 = arith.constant dense<0.000000e+00> : vector<8x384xf32>
    %90 = tpu.matmul %85, %4, %cst_33 {dimension_numbers = #tpu.dot_dimension_numbers<[1], [0], [0], [1], [0, 0, 1, 1], [], []>} : vector<8x128xf32>, vector<128x384xf32>, vector<8x384xf32> -> vector<8x384xf32>
    %91 = arith.index_cast %c2_i32 : i32 to index
    %c0_34 = arith.constant 0 : index
    %c0_35 = arith.constant 0 : index
    %92 = vector.load %arg11[%91, %c0_34, %c0_35] : memref<8x8x384xf32, #tpu.memory_space<vmem>>, vector<1x8x384xf32>
    %93 = vector.shape_cast %92 : vector<1x8x384xf32> to vector<8x384xf32>
    %94 = vector.extract_strided_slice %93 {offsets = [0, 0], sizes = [8, 128], strides = [1, 1]} : vector<8x384xf32> to vector<8x128xf32>
    %95 = vector.extract_strided_slice %90 {offsets = [0, 0], sizes = [8, 128], strides = [1, 1]} : vector<8x384xf32> to vector<8x128xf32>
    %96 = arith.addf %94, %95 : vector<8x128xf32>
    %97 = arith.negf %96 : vector<8x128xf32>
    %98 = math.exp %97 : vector<8x128xf32>
    %cst_36 = arith.constant 1.000000e+00 : f32
    %99 = vector.broadcast %cst_36 : f32 to vector<8x128xf32>
    %100 = arith.addf %99, %98 : vector<8x128xf32>
    %101 = arith.divf %99, %100 : vector<8x128xf32>
    %102 = vector.extract_strided_slice %93 {offsets = [0, 128], sizes = [8, 128], strides = [1, 1]} : vector<8x384xf32> to vector<8x128xf32>
    %103 = vector.extract_strided_slice %90 {offsets = [0, 128], sizes = [8, 128], strides = [1, 1]} : vector<8x384xf32> to vector<8x128xf32>
    %104 = arith.addf %102, %103 : vector<8x128xf32>
    %105 = arith.negf %104 : vector<8x128xf32>
    %106 = math.exp %105 : vector<8x128xf32>
    %cst_37 = arith.constant 1.000000e+00 : f32
    %107 = vector.broadcast %cst_37 : f32 to vector<8x128xf32>
    %108 = arith.addf %107, %106 : vector<8x128xf32>
    %109 = arith.divf %107, %108 : vector<8x128xf32>
    %110 = vector.extract_strided_slice %93 {offsets = [0, 256], sizes = [8, 128], strides = [1, 1]} : vector<8x384xf32> to vector<8x128xf32>
    %111 = vector.extract_strided_slice %90 {offsets = [0, 256], sizes = [8, 128], strides = [1, 1]} : vector<8x384xf32> to vector<8x128xf32>
    %112 = vector.broadcast %6 : vector<1x128xf32> to vector<8x128xf32>
    %113 = arith.addf %111, %112 : vector<8x128xf32>
    %114 = arith.mulf %101, %113 : vector<8x128xf32>
    %115 = arith.addf %110, %114 : vector<8x128xf32>
    %116 = math.tanh %115 : vector<8x128xf32>
    %117 = arith.subf %85, %116 : vector<8x128xf32>
    %118 = arith.mulf %109, %117 : vector<8x128xf32>
    %119 = arith.addf %116, %118 : vector<8x128xf32>
    %120 = arith.addi %14, %c2_i32 : i32
    %c8_i32_38 = arith.constant 8 : i32
    %121 = arith.cmpi slt, %120, %c8_i32_38 : i32
    %122 = arith.select %121, %119, %85 : vector<8x128xf32>
    %123 = arith.index_cast %c2_i32 : i32 to index
    %c0_39 = arith.constant 0 : index
    %c0_40 = arith.constant 0 : index
    %124 = vector.load %arg8[%123, %c0_39, %c0_40] : memref<8x8x128xf32, #tpu.memory_space<vmem>>, vector<1x8x128xf32>
    %125 = vector.shape_cast %124 : vector<1x8x128xf32> to vector<8x128xf32>
    %126 = vector.shape_cast %122 : vector<8x128xf32> to vector<1x8x128xf32>
    tpu.vector_store %arg8[%123, %c0_39, %c0_40], %126 {strides = array<i32>} : memref<8x8x128xf32, #tpu.memory_space<vmem>>, vector<1x8x128xf32>,
    %c3_i32 = arith.constant 3 : i32
    %cst_41 = arith.constant dense<0.000000e+00> : vector<8x384xf32>
    %127 = tpu.matmul %122, %4, %cst_41 {dimension_numbers = #tpu.dot_dimension_numbers<[1], [0], [0], [1], [0, 0, 1, 1], [], []>} : vector<8x128xf32>, vector<128x384xf32>, vector<8x384xf32> -> vector<8x384xf32>
    %128 = arith.index_cast %c3_i32 : i32 to index
    %c0_42 = arith.constant 0 : index
    %c0_43 = arith.constant 0 : index
    %129 = vector.load %arg11[%128, %c0_42, %c0_43] : memref<8x8x384xf32, #tpu.memory_space<vmem>>, vector<1x8x384xf32>
    %130 = vector.shape_cast %129 : vector<1x8x384xf32> to vector<8x384xf32>
    %131 = vector.extract_strided_slice %130 {offsets = [0, 0], sizes = [8, 128], strides = [1, 1]} : vector<8x384xf32> to vector<8x128xf32>
    %132 = vector.extract_strided_slice %127 {offsets = [0, 0], sizes = [8, 128], strides = [1, 1]} : vector<8x384xf32> to vector<8x128xf32>
    %133 = arith.addf %131, %132 : vector<8x128xf32>
    %134 = arith.negf %133 : vector<8x128xf32>
    %135 = math.exp %134 : vector<8x128xf32>
    %cst_44 = arith.constant 1.000000e+00 : f32
    %136 = vector.broadcast %cst_44 : f32 to vector<8x128xf32>
    %137 = arith.addf %136, %135 : vector<8x128xf32>
    %138 = arith.divf %136, %137 : vector<8x128xf32>
    %139 = vector.extract_strided_slice %130 {offsets = [0, 128], sizes = [8, 128], strides = [1, 1]} : vector<8x384xf32> to vector<8x128xf32>
    %140 = vector.extract_strided_slice %127 {offsets = [0, 128], sizes = [8, 128], strides = [1, 1]} : vector<8x384xf32> to vector<8x128xf32>
    %141 = arith.addf %139, %140 : vector<8x128xf32>
    %142 = arith.negf %141 : vector<8x128xf32>
    %143 = math.exp %142 : vector<8x128xf32>
    %cst_45 = arith.constant 1.000000e+00 : f32
    %144 = vector.broadcast %cst_45 : f32 to vector<8x128xf32>
    %145 = arith.addf %144, %143 : vector<8x128xf32>
    %146 = arith.divf %144, %145 : vector<8x128xf32>
    %147 = vector.extract_strided_slice %130 {offsets = [0, 256], sizes = [8, 128], strides = [1, 1]} : vector<8x384xf32> to vector<8x128xf32>
    %148 = vector.extract_strided_slice %127 {offsets = [0, 256], sizes = [8, 128], strides = [1, 1]} : vector<8x384xf32> to vector<8x128xf32>
    %149 = vector.broadcast %6 : vector<1x128xf32> to vector<8x128xf32>
    %150 = arith.addf %148, %149 : vector<8x128xf32>
    %151 = arith.mulf %138, %150 : vector<8x128xf32>
    %152 = arith.addf %147, %151 : vector<8x128xf32>
    %153 = math.tanh %152 : vector<8x128xf32>
    %154 = arith.subf %122, %153 : vector<8x128xf32>
    %155 = arith.mulf %146, %154 : vector<8x128xf32>
    %156 = arith.addf %153, %155 : vector<8x128xf32>
    %157 = arith.addi %14, %c3_i32 : i32
    %c8_i32_46 = arith.constant 8 : i32
    %158 = arith.cmpi slt, %157, %c8_i32_46 : i32
    %159 = arith.select %158, %156, %122 : vector<8x128xf32>
    %160 = arith.index_cast %c3_i32 : i32 to index
    %c0_47 = arith.constant 0 : index
    %c0_48 = arith.constant 0 : index
    %161 = vector.load %arg8[%160, %c0_47, %c0_48] : memref<8x8x128xf32, #tpu.memory_space<vmem>>, vector<1x8x128xf32>
    %162 = vector.shape_cast %161 : vector<1x8x128xf32> to vector<8x128xf32>
    %163 = vector.shape_cast %159 : vector<8x128xf32> to vector<1x8x128xf32>
    tpu.vector_store %arg8[%160, %c0_47, %c0_48], %163 {strides = array<i32>} : memref<8x8x128xf32, #tpu.memory_space<vmem>>, vector<1x8x128xf32>,
    %c4_i32 = arith.constant 4 : i32
    %cst_49 = arith.constant dense<0.000000e+00> : vector<8x384xf32>
    %164 = tpu.matmul %159, %4, %cst_49 {dimension_numbers = #tpu.dot_dimension_numbers<[1], [0], [0], [1], [0, 0, 1, 1], [], []>} : vector<8x128xf32>, vector<128x384xf32>, vector<8x384xf32> -> vector<8x384xf32>
    %165 = arith.index_cast %c4_i32 : i32 to index
    %c0_50 = arith.constant 0 : index
    %c0_51 = arith.constant 0 : index
    %166 = vector.load %arg11[%165, %c0_50, %c0_51] : memref<8x8x384xf32, #tpu.memory_space<vmem>>, vector<1x8x384xf32>
    %167 = vector.shape_cast %166 : vector<1x8x384xf32> to vector<8x384xf32>
    %168 = vector.extract_strided_slice %167 {offsets = [0, 0], sizes = [8, 128], strides = [1, 1]} : vector<8x384xf32> to vector<8x128xf32>
    %169 = vector.extract_strided_slice %164 {offsets = [0, 0], sizes = [8, 128], strides = [1, 1]} : vector<8x384xf32> to vector<8x128xf32>
    %170 = arith.addf %168, %169 : vector<8x128xf32>
    %171 = arith.negf %170 : vector<8x128xf32>
    %172 = math.exp %171 : vector<8x128xf32>
    %cst_52 = arith.constant 1.000000e+00 : f32
    %173 = vector.broadcast %cst_52 : f32 to vector<8x128xf32>
    %174 = arith.addf %173, %172 : vector<8x128xf32>
    %175 = arith.divf %173, %174 : vector<8x128xf32>
    %176 = vector.extract_strided_slice %167 {offsets = [0, 128], sizes = [8, 128], strides = [1, 1]} : vector<8x384xf32> to vector<8x128xf32>
    %177 = vector.extract_strided_slice %164 {offsets = [0, 128], sizes = [8, 128], strides = [1, 1]} : vector<8x384xf32> to vector<8x128xf32>
    %178 = arith.addf %176, %177 : vector<8x128xf32>
    %179 = arith.negf %178 : vector<8x128xf32>
    %180 = math.exp %179 : vector<8x128xf32>
    %cst_53 = arith.constant 1.000000e+00 : f32
    %181 = vector.broadcast %cst_53 : f32 to vector<8x128xf32>
    %182 = arith.addf %181, %180 : vector<8x128xf32>
    %183 = arith.divf %181, %182 : vector<8x128xf32>
    %184 = vector.extract_strided_slice %167 {offsets = [0, 256], sizes = [8, 128], strides = [1, 1]} : vector<8x384xf32> to vector<8x128xf32>
    %185 = vector.extract_strided_slice %164 {offsets = [0, 256], sizes = [8, 128], strides = [1, 1]} : vector<8x384xf32> to vector<8x128xf32>
    %186 = vector.broadcast %6 : vector<1x128xf32> to vector<8x128xf32>
    %187 = arith.addf %185, %186 : vector<8x128xf32>
    %188 = arith.mulf %175, %187 : vector<8x128xf32>
    %189 = arith.addf %184, %188 : vector<8x128xf32>
    %190 = math.tanh %189 : vector<8x128xf32>
    %191 = arith.subf %159, %190 : vector<8x128xf32>
    %192 = arith.mulf %183, %191 : vector<8x128xf32>
    %193 = arith.addf %190, %192 : vector<8x128xf32>
    %194 = arith.addi %14, %c4_i32 : i32
    %c8_i32_54 = arith.constant 8 : i32
    %195 = arith.cmpi slt, %194, %c8_i32_54 : i32
    %196 = arith.select %195, %193, %159 : vector<8x128xf32>
    %197 = arith.index_cast %c4_i32 : i32 to index
    %c0_55 = arith.constant 0 : index
    %c0_56 = arith.constant 0 : index
    %198 = vector.load %arg8[%197, %c0_55, %c0_56] : memref<8x8x128xf32, #tpu.memory_space<vmem>>, vector<1x8x128xf32>
    %199 = vector.shape_cast %198 : vector<1x8x128xf32> to vector<8x128xf32>
    %200 = vector.shape_cast %196 : vector<8x128xf32> to vector<1x8x128xf32>
    tpu.vector_store %arg8[%197, %c0_55, %c0_56], %200 {strides = array<i32>} : memref<8x8x128xf32, #tpu.memory_space<vmem>>, vector<1x8x128xf32>,
    %c5_i32 = arith.constant 5 : i32
    %cst_57 = arith.constant dense<0.000000e+00> : vector<8x384xf32>
    %201 = tpu.matmul %196, %4, %cst_57 {dimension_numbers = #tpu.dot_dimension_numbers<[1], [0], [0], [1], [0, 0, 1, 1], [], []>} : vector<8x128xf32>, vector<128x384xf32>, vector<8x384xf32> -> vector<8x384xf32>
    %202 = arith.index_cast %c5_i32 : i32 to index
    %c0_58 = arith.constant 0 : index
    %c0_59 = arith.constant 0 : index
    %203 = vector.load %arg11[%202, %c0_58, %c0_59] : memref<8x8x384xf32, #tpu.memory_space<vmem>>, vector<1x8x384xf32>
    %204 = vector.shape_cast %203 : vector<1x8x384xf32> to vector<8x384xf32>
    %205 = vector.extract_strided_slice %204 {offsets = [0, 0], sizes = [8, 128], strides = [1, 1]} : vector<8x384xf32> to vector<8x128xf32>
    %206 = vector.extract_strided_slice %201 {offsets = [0, 0], sizes = [8, 128], strides = [1, 1]} : vector<8x384xf32> to vector<8x128xf32>
    %207 = arith.addf %205, %206 : vector<8x128xf32>
    %208 = arith.negf %207 : vector<8x128xf32>
    %209 = math.exp %208 : vector<8x128xf32>
    %cst_60 = arith.constant 1.000000e+00 : f32
    %210 = vector.broadcast %cst_60 : f32 to vector<8x128xf32>
    %211 = arith.addf %210, %209 : vector<8x128xf32>
    %212 = arith.divf %210, %211 : vector<8x128xf32>
    %213 = vector.extract_strided_slice %204 {offsets = [0, 128], sizes = [8, 128], strides = [1, 1]} : vector<8x384xf32> to vector<8x128xf32>
    %214 = vector.extract_strided_slice %201 {offsets = [0, 128], sizes = [8, 128], strides = [1, 1]} : vector<8x384xf32> to vector<8x128xf32>
    %215 = arith.addf %213, %214 : vector<8x128xf32>
    %216 = arith.negf %215 : vector<8x128xf32>
    %217 = math.exp %216 : vector<8x128xf32>
    %cst_61 = arith.constant 1.000000e+00 : f32
    %218 = vector.broadcast %cst_61 : f32 to vector<8x128xf32>
    %219 = arith.addf %218, %217 : vector<8x128xf32>
    %220 = arith.divf %218, %219 : vector<8x128xf32>
    %221 = vector.extract_strided_slice %204 {offsets = [0, 256], sizes = [8, 128], strides = [1, 1]} : vector<8x384xf32> to vector<8x128xf32>
    %222 = vector.extract_strided_slice %201 {offsets = [0, 256], sizes = [8, 128], strides = [1, 1]} : vector<8x384xf32> to vector<8x128xf32>
    %223 = vector.broadcast %6 : vector<1x128xf32> to vector<8x128xf32>
    %224 = arith.addf %222, %223 : vector<8x128xf32>
    %225 = arith.mulf %212, %224 : vector<8x128xf32>
    %226 = arith.addf %221, %225 : vector<8x128xf32>
    %227 = math.tanh %226 : vector<8x128xf32>
    %228 = arith.subf %196, %227 : vector<8x128xf32>
    %229 = arith.mulf %220, %228 : vector<8x128xf32>
    %230 = arith.addf %227, %229 : vector<8x128xf32>
    %231 = arith.addi %14, %c5_i32 : i32
    %c8_i32_62 = arith.constant 8 : i32
    %232 = arith.cmpi slt, %231, %c8_i32_62 : i32
    %233 = arith.select %232, %230, %196 : vector<8x128xf32>
    %234 = arith.index_cast %c5_i32 : i32 to index
    %c0_63 = arith.constant 0 : index
    %c0_64 = arith.constant 0 : index
    %235 = vector.load %arg8[%234, %c0_63, %c0_64] : memref<8x8x128xf32, #tpu.memory_space<vmem>>, vector<1x8x128xf32>
    %236 = vector.shape_cast %235 : vector<1x8x128xf32> to vector<8x128xf32>
    %237 = vector.shape_cast %233 : vector<8x128xf32> to vector<1x8x128xf32>
    tpu.vector_store %arg8[%234, %c0_63, %c0_64], %237 {strides = array<i32>} : memref<8x8x128xf32, #tpu.memory_space<vmem>>, vector<1x8x128xf32>,
    %c6_i32 = arith.constant 6 : i32
    %cst_65 = arith.constant dense<0.000000e+00> : vector<8x384xf32>
    %238 = tpu.matmul %233, %4, %cst_65 {dimension_numbers = #tpu.dot_dimension_numbers<[1], [0], [0], [1], [0, 0, 1, 1], [], []>} : vector<8x128xf32>, vector<128x384xf32>, vector<8x384xf32> -> vector<8x384xf32>
    %239 = arith.index_cast %c6_i32 : i32 to index
    %c0_66 = arith.constant 0 : index
    %c0_67 = arith.constant 0 : index
    %240 = vector.load %arg11[%239, %c0_66, %c0_67] : memref<8x8x384xf32, #tpu.memory_space<vmem>>, vector<1x8x384xf32>
    %241 = vector.shape_cast %240 : vector<1x8x384xf32> to vector<8x384xf32>
    %242 = vector.extract_strided_slice %241 {offsets = [0, 0], sizes = [8, 128], strides = [1, 1]} : vector<8x384xf32> to vector<8x128xf32>
    %243 = vector.extract_strided_slice %238 {offsets = [0, 0], sizes = [8, 128], strides = [1, 1]} : vector<8x384xf32> to vector<8x128xf32>
    %244 = arith.addf %242, %243 : vector<8x128xf32>
    %245 = arith.negf %244 : vector<8x128xf32>
    %246 = math.exp %245 : vector<8x128xf32>
    %cst_68 = arith.constant 1.000000e+00 : f32
    %247 = vector.broadcast %cst_68 : f32 to vector<8x128xf32>
    %248 = arith.addf %247, %246 : vector<8x128xf32>
    %249 = arith.divf %247, %248 : vector<8x128xf32>
    %250 = vector.extract_strided_slice %241 {offsets = [0, 128], sizes = [8, 128], strides = [1, 1]} : vector<8x384xf32> to vector<8x128xf32>
    %251 = vector.extract_strided_slice %238 {offsets = [0, 128], sizes = [8, 128], strides = [1, 1]} : vector<8x384xf32> to vector<8x128xf32>
    %252 = arith.addf %250, %251 : vector<8x128xf32>
    %253 = arith.negf %252 : vector<8x128xf32>
    %254 = math.exp %253 : vector<8x128xf32>
    %cst_69 = arith.constant 1.000000e+00 : f32
    %255 = vector.broadcast %cst_69 : f32 to vector<8x128xf32>
    %256 = arith.addf %255, %254 : vector<8x128xf32>
    %257 = arith.divf %255, %256 : vector<8x128xf32>
    %258 = vector.extract_strided_slice %241 {offsets = [0, 256], sizes = [8, 128], strides = [1, 1]} : vector<8x384xf32> to vector<8x128xf32>
    %259 = vector.extract_strided_slice %238 {offsets = [0, 256], sizes = [8, 128], strides = [1, 1]} : vector<8x384xf32> to vector<8x128xf32>
    %260 = vector.broadcast %6 : vector<1x128xf32> to vector<8x128xf32>
    %261 = arith.addf %259, %260 : vector<8x128xf32>
    %262 = arith.mulf %249, %261 : vector<8x128xf32>
    %263 = arith.addf %258, %262 : vector<8x128xf32>
    %264 = math.tanh %263 : vector<8x128xf32>
    %265 = arith.subf %233, %264 : vector<8x128xf32>
    %266 = arith.mulf %257, %265 : vector<8x128xf32>
    %267 = arith.addf %264, %266 : vector<8x128xf32>
    %268 = arith.addi %14, %c6_i32 : i32
    %c8_i32_70 = arith.constant 8 : i32
    %269 = arith.cmpi slt, %268, %c8_i32_70 : i32
    %270 = arith.select %269, %267, %233 : vector<8x128xf32>
    %271 = arith.index_cast %c6_i32 : i32 to index
    %c0_71 = arith.constant 0 : index
    %c0_72 = arith.constant 0 : index
    %272 = vector.load %arg8[%271, %c0_71, %c0_72] : memref<8x8x128xf32, #tpu.memory_space<vmem>>, vector<1x8x128xf32>
    %273 = vector.shape_cast %272 : vector<1x8x128xf32> to vector<8x128xf32>
    %274 = vector.shape_cast %270 : vector<8x128xf32> to vector<1x8x128xf32>
    tpu.vector_store %arg8[%271, %c0_71, %c0_72], %274 {strides = array<i32>} : memref<8x8x128xf32, #tpu.memory_space<vmem>>, vector<1x8x128xf32>,
    %c7_i32 = arith.constant 7 : i32
    %cst_73 = arith.constant dense<0.000000e+00> : vector<8x384xf32>
    %275 = tpu.matmul %270, %4, %cst_73 {dimension_numbers = #tpu.dot_dimension_numbers<[1], [0], [0], [1], [0, 0, 1, 1], [], []>} : vector<8x128xf32>, vector<128x384xf32>, vector<8x384xf32> -> vector<8x384xf32>
    %276 = arith.index_cast %c7_i32 : i32 to index
    %c0_74 = arith.constant 0 : index
    %c0_75 = arith.constant 0 : index
    %277 = vector.load %arg11[%276, %c0_74, %c0_75] : memref<8x8x384xf32, #tpu.memory_space<vmem>>, vector<1x8x384xf32>
    %278 = vector.shape_cast %277 : vector<1x8x384xf32> to vector<8x384xf32>
    %279 = vector.extract_strided_slice %278 {offsets = [0, 0], sizes = [8, 128], strides = [1, 1]} : vector<8x384xf32> to vector<8x128xf32>
    %280 = vector.extract_strided_slice %275 {offsets = [0, 0], sizes = [8, 128], strides = [1, 1]} : vector<8x384xf32> to vector<8x128xf32>
    %281 = arith.addf %279, %280 : vector<8x128xf32>
    %282 = arith.negf %281 : vector<8x128xf32>
    %283 = math.exp %282 : vector<8x128xf32>
    %cst_76 = arith.constant 1.000000e+00 : f32
    %284 = vector.broadcast %cst_76 : f32 to vector<8x128xf32>
    %285 = arith.addf %284, %283 : vector<8x128xf32>
    %286 = arith.divf %284, %285 : vector<8x128xf32>
    %287 = vector.extract_strided_slice %278 {offsets = [0, 128], sizes = [8, 128], strides = [1, 1]} : vector<8x384xf32> to vector<8x128xf32>
    %288 = vector.extract_strided_slice %275 {offsets = [0, 128], sizes = [8, 128], strides = [1, 1]} : vector<8x384xf32> to vector<8x128xf32>
    %289 = arith.addf %287, %288 : vector<8x128xf32>
    %290 = arith.negf %289 : vector<8x128xf32>
    %291 = math.exp %290 : vector<8x128xf32>
    %cst_77 = arith.constant 1.000000e+00 : f32
    %292 = vector.broadcast %cst_77 : f32 to vector<8x128xf32>
    %293 = arith.addf %292, %291 : vector<8x128xf32>
    %294 = arith.divf %292, %293 : vector<8x128xf32>
    %295 = vector.extract_strided_slice %278 {offsets = [0, 256], sizes = [8, 128], strides = [1, 1]} : vector<8x384xf32> to vector<8x128xf32>
    %296 = vector.extract_strided_slice %275 {offsets = [0, 256], sizes = [8, 128], strides = [1, 1]} : vector<8x384xf32> to vector<8x128xf32>
    %297 = vector.broadcast %6 : vector<1x128xf32> to vector<8x128xf32>
    %298 = arith.addf %296, %297 : vector<8x128xf32>
    %299 = arith.mulf %286, %298 : vector<8x128xf32>
    %300 = arith.addf %295, %299 : vector<8x128xf32>
    %301 = math.tanh %300 : vector<8x128xf32>
    %302 = arith.subf %270, %301 : vector<8x128xf32>
    %303 = arith.mulf %294, %302 : vector<8x128xf32>
    %304 = arith.addf %301, %303 : vector<8x128xf32>
    %305 = arith.addi %14, %c7_i32 : i32
    %c8_i32_78 = arith.constant 8 : i32
    %306 = arith.cmpi slt, %305, %c8_i32_78 : i32
    %307 = arith.select %306, %304, %270 : vector<8x128xf32>
    %308 = arith.index_cast %c7_i32 : i32 to index
    %c0_79 = arith.constant 0 : index
    %c0_80 = arith.constant 0 : index
    %309 = vector.load %arg8[%308, %c0_79, %c0_80] : memref<8x8x128xf32, #tpu.memory_space<vmem>>, vector<1x8x128xf32>
    %310 = vector.shape_cast %309 : vector<1x8x128xf32> to vector<8x128xf32>
    %311 = vector.shape_cast %307 : vector<8x128xf32> to vector<1x8x128xf32>
    tpu.vector_store %arg8[%308, %c0_79, %c0_80], %311 {strides = array<i32>} : memref<8x8x128xf32, #tpu.memory_space<vmem>>, vector<1x8x128xf32>,
    %c8_i32_81 = arith.constant 8 : i32
    %c0_82 = arith.constant 0 : index
    %c0_83 = arith.constant 0 : index
    %312 = vector.load %arg10[%c0_82, %c0_83] : memref<8x128xf32, #tpu.memory_space<vmem>>, vector<8x128xf32>
    tpu.vector_store %arg10[%c0_82, %c0_83], %307 {strides = array<i32>} : memref<8x128xf32, #tpu.memory_space<vmem>>, vector<8x128xf32>,
    %c0_i32_84 = arith.constant 0 : i32
    %313 = arith.cmpi eq, %arg1, %c0_i32_84 : i32
    %314 = arith.extui %313 : i1 to i32
    %c0_i32_85 = arith.constant 0 : i32
    %315 = arith.cmpi ne, %314, %c0_i32_85 : i32
    scf.if %315 {
      %c0_86 = arith.constant 0 : index
      %c0_87 = arith.constant 0 : index
      %316 = vector.load %arg9[%c0_86, %c0_87] : memref<8x128xf32, #tpu.memory_space<vmem>>, vector<8x128xf32>
      tpu.vector_store %arg9[%c0_86, %c0_87], %307 {strides = array<i32>} : memref<8x128xf32, #tpu.memory_space<vmem>>, vector<8x128xf32>,
    } else {
    }
    return
  }
  func.func @transform_0(%arg0: i32, %arg1: i32) -> (i32, i32, i32) {
    %c0_i32 = arith.constant 0 : i32
    %c0_i32_0 = arith.constant 0 : i32
    return %arg1, %arg0, %c0_i32 : i32, i32, i32
  }
  func.func @transform_1(%arg0: i32, %arg1: i32) -> (i32, i32) {
    %c0_i32 = arith.constant 0 : i32
    %c0_i32_0 = arith.constant 0 : i32
    return %arg0, %c0_i32 : i32, i32
  }
  func.func @transform_2(%arg0: i32, %arg1: i32) -> (i32, i32) {
    %c0_i32 = arith.constant 0 : i32
    %c0_i32_0 = arith.constant 0 : i32
    %c0_i32_1 = arith.constant 0 : i32
    return %c0_i32, %c0_i32_0 : i32, i32
  }
  func.func @transform_3(%arg0: i32, %arg1: i32) -> (i32, i32) {
    %c0_i32 = arith.constant 0 : i32
    %c0_i32_0 = arith.constant 0 : i32
    %c0_i32_1 = arith.constant 0 : i32
    return %c0_i32, %c0_i32_0 : i32, i32
  }
  func.func @transform_4(%arg0: i32, %arg1: i32) -> (i32, i32) {
    %c0_i32 = arith.constant 0 : i32
    %c0_i32_0 = arith.constant 0 : i32
    %c0_i32_1 = arith.constant 0 : i32
    return %c0_i32, %c0_i32_0 : i32, i32
  }
  func.func @transform_5(%arg0: i32, %arg1: i32) -> (i32, i32) {
    %c0_i32 = arith.constant 0 : i32
    %c0_i32_0 = arith.constant 0 : i32
    %c0_i32_1 = arith.constant 0 : i32
    return %c0_i32, %c0_i32_0 : i32, i32
  }
  func.func @transform_6(%arg0: i32, %arg1: i32) -> (i32, i32, i32) {
    %c0_i32 = arith.constant 0 : i32
    %c0_i32_0 = arith.constant 0 : i32
    return %arg1, %arg0, %c0_i32 : i32, i32, i32
  }
  func.func @transform_7(%arg0: i32, %arg1: i32) -> (i32, i32) {
    %c0_i32 = arith.constant 0 : i32
    %c0_i32_0 = arith.constant 0 : i32
    return %arg0, %c0_i32 : i32, i32
  }
}

</mosaic_0001>

<bundles_post_ra>
// kernel: gru_char_forward.5
= control target key start
LH: loop header
LB: loop body
LE: loop exit
PB: predicated region body
PF: predicated region fallthrough
CT: control target
= control target key end

     0   :  { %8 = vsyncpa [#allocation3], 0  ;;  %s523_s0 = inlined_call_operand.hbm [shape: f32[64,128], index: 0, kind: input, shape index: {}]   ;;  %s524_s1 = inlined_call_operand.hbm [shape: f32[128,128], index: 1, kind: input, shape index: {}]   ;;  %s525_s2 = inlined_call_operand.hbm [shape: f32[1,128], index: 2, kind: input, shape index: {}]   ;;  %s526_s3 = inlined_call_operand.hbm [shape: f32[64,128], index: 3, kind: output, shape index: {}]  }
   0x1   :  { %9 = vsyncpa [#allocation6], 0 }
   0x2   :  { %10 = vsyncpa [#allocation4], 0  ;;  %s433_s12 = smov [#allocation5]   ;;  %s434_s14 = smov [#allocation2]  }
   0x3   :  { %s28_s13 = sshll.u32 %s433_s12, 4  ;;  %s16_s15 = sshll.u32 %s434_s14, 4  ;;  %s29_s13 = int_to_ptr.vmem [resolvable:$true] %s28_s13  ;;  %s459_s15 = int_to_ptr.vmem [resolvable:$true] %s16_s15 }
   0x4   :  { %s339_s18 = scalar_lea.hbm %s524_s1, 2048 }
   0x5   :  { %p340_p0 = scmp.ne.s32.totalorder %s524_s1, %s339_s18  ;;  %p343_p1 = scmp.lt.u32.totalorder %s339_s18, %s524_s1 }
   0x7   :  { %p345_p2 = pnand %p343_p1, %p340_p0 }
   0x9   :  { %348 = shalt.err (!%p345_p2)
}
   0xa   :  { %s349_s23 = scalar_lea.vmem %s29_s13, 2048  ;;  %p354_p4 = scmp.lt.s32.totalorder %s29_s13, %s29_s13 }
   0xb   :  { %p350_p3 = scmp.ne.s32.totalorder %s29_s13, %s349_s23  ;;  %p355_p5 = scmp.lt.s32.totalorder %s349_s23, %s349_s23 }
   0xd   :  { %p356_p6 = por %p355_p5, %p354_p4 }
   0xf   :  { %p357_p7 = pnand %p356_p6, %p350_p3 }
  0x11   :  { %360 = shalt.err (!%p357_p7)
}
  0x12   :  { %s435_s24 = smov 128   ;;  %s436_s25 = smov 8  }
  0x13   :  { %34 = dma.hbm_to_vmem [thread:$0]  %s524_s1, 2048, %s29_s13, [#allocation6], %s435_s24, %s435_s24, %s436_s25  }
  0x14   :  { %s361_s30 = scalar_lea.hbm %s523_s0, 1024 }
  0x15   :  { %p362_p8 = scmp.ne.s32.totalorder %s523_s0, %s361_s30  ;;  %p365_p9 = scmp.lt.u32.totalorder %s361_s30, %s523_s0 }
  0x17   :  { %p367_p10 = pnand %p365_p9, %p362_p8 }
  0x19   :  { %370 = shalt.err (!%p367_p10)
}
  0x1a   :  { %s371_s8 = scalar_lea.vmem %s459_s15, 1024  ;;  %p376_p12 = scmp.lt.s32.totalorder %s459_s15, %s459_s15 }
  0x1b   :  { %p372_p11 = scmp.ne.s32.totalorder %s459_s15, %s371_s8  ;;  %p377_p13 = scmp.lt.s32.totalorder %s371_s8, %s371_s8 }
  0x1d   :  { %p378_p0 = por %p377_p13, %p376_p12 }
  0x1f   :  { %p379_p1 = pnand %p378_p0, %p372_p11 }
  0x21   :  { %382 = shalt.err (!%p379_p1)
}
  0x22   :  { %22 = dma.hbm_to_vmem [thread:$0]  %s523_s0, 1024, %s459_s15, [#allocation3], %s435_s24, %s435_s24, %s436_s25  }
  0x23   :  { %s437_s10 = smov [#allocation7]   ;;  %s383_s14 = scalar_lea.hbm %s525_s2, 16 }
  0x24   :  { %s41_s11 = sshll.u32 %s437_s10, 4  ;;  %p384_p2 = scmp.ne.s32.totalorder %s525_s2, %s383_s14  ;;  %s42_s11 = int_to_ptr.vmem [resolvable:$true] %s41_s11 }
  0x25   :  { %p387_p3 = scmp.lt.u32.totalorder %s383_s14, %s525_s2 }
  0x27   :  { %p389_p4 = pnand %p387_p3, %p384_p2 }
  0x29   :  { %392 = shalt.err (!%p389_p4)
}
  0x2a   :  { %s393_s20 = scalar_lea.vmem %s42_s11, 16  ;;  %s397_s0 = scalar_lea.vmem %s42_s11, 32 }
  0x2b   :  { %p394_p5 = scmp.ne.s32.totalorder %s42_s11, %s393_s20  ;;  %p398_p6 = scmp.lt.s32.totalorder %s42_s11, %s42_s11 }
  0x2c   :  { %p399_p7 = scmp.lt.s32.totalorder %s397_s0, %s393_s20 }
  0x2e   :  { %p400_p8 = por %p399_p7, %p398_p6 }
  0x30   :  { %p401_p9 = pnand %p400_p8, %p394_p5 }
  0x32   :  { %404 = shalt.err (!%p401_p9)
}
  0x33   :  { %44 = dma.hbm_to_vmem [thread:$0]  %s525_s2, 16, %s42_s11, [#allocation6]  }
  0x34   :  { %427 = dma.done.wait [#allocation3], 1024  }
  0x35   :  { %428 = vsyncadd [#allocation3], 4294966272 }
  0x36   :  { %429 = dma.done.wait [#allocation6], 2064  }
  0x37   :  { %430 = vsyncadd [#allocation6], 4294965232  ;;  %v54_v0 = vld [vmem:[#allocation5] sm:$0xff]  ;;  %v55_v1 = vld [vmem:[#allocation5 + $0x8] sm:$0xff]  ;;  %s438_s2 = smov [#allocation8]  }
  0x38   :  { %v56_v2 = vld [vmem:[#allocation5 + $0x10] sm:$0xff]  ;;  %v285_v3 = vpack.c.bf16 %v55_v1, %v54_v0  ;;  %v57_v4 = vld [vmem:[#allocation5 + $0x18] sm:$0xff]  ;;  %v58_v6 = vld [vmem:[#allocation5 + $0x20] sm:$0xff]  ;;  %s203_s22 = sshll.u32 %s438_s2, 4  ;;  %s204_s22 = int_to_ptr.vmem [resolvable:$true] %s203_s22 }
  0x39   :  { %v289_v5 = vpack.c.bf16 %v57_v4, %v56_v2  ;;  %v59_v7 = vld [vmem:[#allocation5 + $0x28] sm:$0xff]  ;;  %v70_v9 = vld [vmem:[#allocation2] sm:$0xff]  ;;  %v60_v11 = vld [vmem:[#allocation5 + $0x30] sm:$0xff]  ;;  %s405_s23 = scalar_lea.vmem %s204_s22, 1024  ;;  %p410_p11 = scmp.lt.s32.totalorder %s204_s22, %s204_s22 }
  0x3a   :  { %286 = vmatprep.subr.bf16.mxu0 %v285_v3  ;;  %317 = vmatprep.subr.bf16.mxu1 %v285_v3  ;;  %v293_v8 = vpack.c.bf16 %v59_v7, %v58_v6  ;;  %v74_v10 = vld [vmem:[#allocation2 + $0x20] sm:$0xff]  ;;  %v61_v12 = vld [vmem:[#allocation5 + $0x38] sm:$0xff]  ;;  %v63_v15 = vld [vmem:[#allocation5 + $0x48] sm:$0xff]  ;;  %p406_p10 = scmp.ne.s32.totalorder %s204_s22, %s405_s23  ;;  %p411_p12 = scmp.lt.s32.totalorder %s405_s23, %s405_s23 }
  0x3b   :  { %288 = vmatpush3.bf16.msra.mxu0 %v285_v3  ;;  %325 = vmatpush3.bf16.msra.mxu1 %v285_v3  ;;  %v297_v13 = vpack.c.bf16 %v61_v12, %v60_v11  ;;  %v62_v14 = vld [vmem:[#allocation5 + $0x40] sm:$0xff]  ;;  %v64_v17 = vld [vmem:[#allocation5 + $0x50] sm:$0xff]  ;;  %v65_v18 = vld [vmem:[#allocation5 + $0x58] sm:$0xff] }
  0x3c   :  { %290 = vmatprep.subr.bf16.mxu0 %v289_v5  ;;  %318 = vmatprep.subr.bf16.mxu1 %v289_v5  ;;  %v301_v16 = vpack.c.bf16 %v63_v15, %v62_v14  ;;  %v305_v19 = vpack.c.bf16 %v65_v18, %v64_v17  ;;  %v66_v20 = vld [vmem:[#allocation5 + $0x60] sm:$0xff]  ;;  %v67_v21 = vld [vmem:[#allocation5 + $0x68] sm:$0xff]  ;;  %v68_v23 = vld [vmem:[#allocation5 + $0x70] sm:$0xff]  ;;  %p412_p13 = por %p411_p12, %p410_p11 }
  0x3d   :  { %273 = vmatprep.mubr.f32.mxu0 %v70_v9  ;;  %279 = vmatprep.mubr.f32.mxu1 %v74_v10  ;;  %v309_v22 = vpack.c.bf16 %v67_v21, %v66_v20  ;;  %v69_v24 = vld [vmem:[#allocation5 + $0x78] sm:$0xff]  ;;  %v71_v26 = vld [vmem:[#allocation2 + $0x8] sm:$0xff]  ;;  %v72_v28 = vld [vmem:[#allocation2 + $0x10] sm:$0xff] }
  0x3e   :  { %v313_v25 = vpack.c.bf16 %v69_v24, %v68_v23  ;;  %v75_v27 = vld [vmem:[#allocation2 + $0x28] sm:$0xff]  ;;  %v76_v29 = vld [vmem:[#allocation2 + $0x30] sm:$0xff]  ;;  %v73_v30 = vld [vmem:[#allocation2 + $0x18] sm:$0xff]  ;;  %p413_p0 = pnand %p412_p13, %p406_p10 }
  0x3f   :  { %292 = vmatpush3.bf16.msra.mxu0 %v289_v5  ;;  %326 = vmatpush3.bf16.msra.mxu1 %v289_v5  ;;  %v77_v31 = vld [vmem:[#allocation2 + $0x38] sm:$0xff]  ;;  %v216_v32 = vld [vmem:[#allocation7] ss:$0 sm:$0xff] }
  0x40   :  { %294 = vmatprep.subr.bf16.mxu0 %v293_v8  ;;  %319 = vmatprep.subr.bf16.mxu1 %v293_v8 }
  0x43   :  { %296 = vmatpush3.bf16.msra.mxu0 %v293_v8  ;;  %327 = vmatpush3.bf16.msra.mxu1 %v293_v8 }
  0x44   :  { %298 = vmatprep.subr.bf16.mxu0 %v297_v13  ;;  %320 = vmatprep.subr.bf16.mxu1 %v297_v13 }
  0x47   :  { %300 = vmatpush3.bf16.msra.mxu0 %v297_v13  ;;  %328 = vmatpush3.bf16.msra.mxu1 %v297_v13 }
  0x48   :  { %302 = vmatprep.subr.bf16.mxu0 %v301_v16  ;;  %321 = vmatprep.subr.bf16.mxu1 %v301_v16 }
  0x4b   :  { %304 = vmatpush3.bf16.msra.mxu0 %v301_v16  ;;  %329 = vmatpush3.bf16.msra.mxu1 %v301_v16 }
  0x4c   :  { %306 = vmatprep.subr.bf16.mxu0 %v305_v19  ;;  %322 = vmatprep.subr.bf16.mxu1 %v305_v19 }
  0x4f   :  { %308 = vmatpush3.bf16.msra.mxu0 %v305_v19  ;;  %330 = vmatpush3.bf16.msra.mxu1 %v305_v19 }
  0x50   :  { %310 = vmatprep.subr.bf16.mxu0 %v309_v22  ;;  %323 = vmatprep.subr.bf16.mxu1 %v309_v22 }
  0x53   :  { %312 = vmatpush3.bf16.msra.mxu0 %v309_v22  ;;  %331 = vmatpush3.bf16.msra.mxu1 %v309_v22 }
  0x54   :  { %314 = vmatprep.subr.bf16.mxu0 %v313_v25  ;;  %324 = vmatprep.subr.bf16.mxu1 %v313_v25 }
  0x57   :  { %316 = vmatpush3.bf16.msra.mxu0 %v313_v25  ;;  %332 = vmatpush3.bf16.msra.mxu1 %v313_v25 }
  0x5a   :  { %274 = vmatmul.mubr.f32.vlgmr.msra.gmra.mrb[0].mxu0 %v71_v26  ;;  %280 = vmatmul.mubr.f32.vlgmr.msra.gmra.mrb[0].mxu1 %v75_v27 }
  0x5b   :  { %276 = vmatprep.mubr.f32.mxu0 %v72_v28  ;;  %282 = vmatprep.mubr.f32.mxu1 %v76_v29 }
  0x5e   :  { %277 = vmatmul.mubr.f32.gmra.mrb[2].mxu0 %v73_v30  ;;  %283 = vmatmul.mubr.f32.gmra.mrb[2].mxu1 %v77_v31 }
 0x12d   :  { %v275_v33 = vpop.f32.mrb[0].mxu0  ;;  %v281_v34 = vpop.f32.mrb[0].mxu1 }
 0x12e   :  { %v157_v35 = vadd.f32 %v275_v33, %v216_v32  ;;  %v177_v36 = vadd.f32 %v281_v34, %v216_v32  ;;  %v151_v37 = vpop.f32.mrb[1].mxu0  ;;  %v171_v38 = vpop.f32.mrb[1].mxu1 }
 0x12f   :  { %v152_v39 = vadd.f32 %v216_v32, %v151_v37  ;;  %v172_v40 = vadd.f32 %v216_v32, %v171_v38 }
 0x130   :  { %191 = vst [vmem:[#allocation8 + $0x8] sm:$0xff] %v157_v35  ;;  %195 = vst [vmem:[#allocation8 + $0x28] sm:$0xff] %v177_v36 }
 0x131   :  { %190 = vst [vmem:[#allocation8] sm:$0xff] %v152_v39  ;;  %194 = vst [vmem:[#allocation8 + $0x20] sm:$0xff] %v172_v40  ;;  %v278_v41 = vpop.f32.mrb[2].mxu0  ;;  %v284_v42 = vpop.f32.mrb[2].mxu1 }
 0x132   :  { %v167_v43 = vadd.f32 %v278_v41, %v216_v32  ;;  %v187_v44 = vadd.f32 %v284_v42, %v216_v32  ;;  %v161_v45 = vpop.f32.mrb[3].mxu0  ;;  %v181_v46 = vpop.f32.mrb[3].mxu1 }
 0x133   :  { %v162_v47 = vadd.f32 %v216_v32, %v161_v45  ;;  %v182_v48 = vadd.f32 %v216_v32, %v181_v46 }
 0x134   :  { %193 = vst [vmem:[#allocation8 + $0x18] sm:$0xff] %v167_v43  ;;  %197 = vst [vmem:[#allocation8 + $0x38] sm:$0xff] %v187_v44 }
 0x135   :  { %192 = vst [vmem:[#allocation8 + $0x10] sm:$0xff] %v162_v47  ;;  %196 = vst [vmem:[#allocation8 + $0x30] sm:$0xff] %v182_v48 }
 0x136   :  { %416 = shalt.err (!%p413_p0)
}
 0x137   :  { %s417_s28 = scalar_lea.hbm %s526_s3, 1024 }
 0x138   :  { %p418_p1 = scmp.ne.s32.totalorder %s526_s3, %s417_s28  ;;  %p421_p2 = scmp.lt.u32.totalorder %s417_s28, %s526_s3 }
 0x13a   :  { %p423_p3 = pnand %p421_p2, %p418_p1 }
 0x13c   :  { %426 = shalt.err (!%p423_p3)
}
 0x13d   :  { %209 = dma.vmem_to_hbm [thread:$0]  %s204_s22, 1024, %s526_s3, [#allocation4], %s435_s24, %s435_s24, %s436_s25  }
 0x13e   :  { %431 = dma.done.wait [#allocation4], 1024  }
 0x13f   :  { %432 = vsyncadd [#allocation4], 4294966272 }
 0x140   :  { %213 = vsyncpa [#allocation3], 1 }
 0x141   :  { %214 = vsyncpa [#allocation6], 1 }
 0x142   :  { %215 = vsyncpa [#allocation4], 1 }

// kernel: gru_char_forward.3
= control target key start
LH: loop header
LB: loop body
LE: loop exit
PB: predicated region body
PF: predicated region fallthrough
CT: control target
= control target key end

     0   :  { %13 = vsyncpa [#allocation5], 0  ;;  %s3820_s0 = inlined_call_operand.hbm [shape: f32[8,8,128], index: 0, kind: input, shape index: {}]   ;;  %s3821_s1 = inlined_call_operand.hbm [shape: f32[8,128], index: 1, kind: input, shape index: {}]   ;;  %s3822_s2 = inlined_call_operand.hbm [shape: f32[128,384], index: 2, kind: input, shape index: {}]   ;;  %s3823_s3 = inlined_call_operand.hbm [shape: f32[1,384], index: 3, kind: input, shape index: {}]   ;;  %s3824_s4 = inlined_call_operand.hbm [shape: f32[128,384], index: 4, kind: input, shape index: {}]   ;;  %s3825_s5 = inlined_call_operand.hbm [shape: f32[1,128], index: 5, kind: input, shape index: {}]   ;;  %s3826_s6 = inlined_call_operand.hbm [shape: f32[8,8,128], index: 6, kind: output, shape index: {0}]   ;;  %s3827_s7 = inlined_call_operand.hbm [shape: f32[8,128], index: 7, kind: output, shape index: {1}]  }
   0x1   :  { %14 = vsyncpa [#allocation8], 0 }
   0x2   :  { %15 = vsyncpa [#allocation11], 0 }
   0x3   :  { %16 = vsyncpa [#allocation14], 0 }
   0x4   :  { %17 = vsyncpa [#allocation6], 0 }
   0x5   :  { %18 = vsyncpa [#allocation17], 0  ;;  %s3237_s24 = smov [#allocation7]   ;;  %s3238_s26 = smov [#allocation10]  }
   0x6   :  { %s37_s25 = sshll.u32 %s3237_s24, 4  ;;  %s59_s27 = sshll.u32 %s3238_s26, 4  ;;  %s38_s25 = int_to_ptr.vmem [resolvable:$true] %s37_s25  ;;  %s60_s27 = int_to_ptr.vmem [resolvable:$true] %s59_s27 }
   0x7   :  { %s3049_s30 = scalar_lea.hbm %s3821_s1, 128 }
   0x8   :  { %p3050_p0 = scmp.ne.s32.totalorder %s3821_s1, %s3049_s30  ;;  %p3053_p1 = scmp.lt.u32.totalorder %s3049_s30, %s3821_s1 }
   0xa   :  { %p3055_p2 = pnand %p3053_p1, %p3050_p0 }
   0xc   :  { %3058 = shalt.err (!%p3055_p2)
}
   0xd   :  { %s3059_s12 = scalar_lea.vmem %s38_s25, 128  ;;  %p3064_p4 = scmp.lt.s32.totalorder %s38_s25, %s38_s25 }
   0xe   :  { %p3060_p3 = scmp.ne.s32.totalorder %s38_s25, %s3059_s12  ;;  %p3065_p5 = scmp.lt.s32.totalorder %s3059_s12, %s3059_s12 }
  0x10   :  { %p3066_p6 = por %p3065_p5, %p3064_p4 }
  0x12   :  { %p3067_p7 = pnand %p3066_p6, %p3060_p3 }
  0x14   :  { %3070 = shalt.err (!%p3067_p7)
}
  0x15   :  { %40 = dma.hbm_to_vmem [thread:$0]  %s3821_s1, 128, %s38_s25, [#allocation8]  }
  0x16   :  { %s3071_s17 = scalar_lea.hbm %s3823_s3, 48 }
  0x17   :  { %p3072_p8 = scmp.ne.s32.totalorder %s3823_s3, %s3071_s17  ;;  %p3075_p9 = scmp.lt.u32.totalorder %s3071_s17, %s3823_s3 }
  0x19   :  { %p3077_p10 = pnand %p3075_p9, %p3072_p8 }
  0x1b   :  { %3080 = shalt.err (!%p3077_p10)
}
  0x1c   :  { %s3081_s22 = scalar_lea.vmem %s60_s27, 48  ;;  %s3085_s23 = scalar_lea.vmem %s60_s27, 64 }
  0x1d   :  { %p3082_p11 = scmp.ne.s32.totalorder %s60_s27, %s3081_s22  ;;  %p3086_p12 = scmp.lt.s32.totalorder %s60_s27, %s60_s27 }
  0x1e   :  { %p3087_p13 = scmp.lt.s32.totalorder %s3085_s23, %s3081_s22 }
  0x20   :  { %p3088_p0 = por %p3087_p13, %p3086_p12 }
  0x22   :  { %p3089_p1 = pnand %p3088_p0, %p3082_p11 }
  0x24   :  { %3092 = shalt.err (!%p3089_p1)
}
  0x25   :  { %62 = dma.hbm_to_vmem [thread:$0]  %s3823_s3, 48, %s60_s27, [#allocation11]  }
  0x26   :  { %s3239_s25 = smov [#allocation4]   ;;  %s3093_s30 = scalar_lea.hbm %s3820_s0, 1024 }
  0x27   :  { %s24_s26 = sshll.u32 %s3239_s25, 4  ;;  %p3094_p2 = scmp.ne.s32.totalorder %s3820_s0, %s3093_s30  ;;  %s25_s26 = int_to_ptr.vmem [resolvable:$true] %s24_s26 }
  0x28   :  { %p3097_p3 = scmp.lt.u32.totalorder %s3093_s30, %s3820_s0 }
  0x2a   :  { %p3099_p4 = pnand %p3097_p3, %p3094_p2 }
  0x2c   :  { %3102 = shalt.err (!%p3099_p4)
}
  0x2d   :  { %s3103_s12 = scalar_lea.vmem %s25_s26, 1024  ;;  %p3108_p6 = scmp.lt.s32.totalorder %s25_s26, %s25_s26 }
  0x2e   :  { %p3104_p5 = scmp.ne.s32.totalorder %s25_s26, %s3103_s12  ;;  %p3109_p7 = scmp.lt.s32.totalorder %s3103_s12, %s3103_s12 }
  0x30   :  { %p3110_p8 = por %p3109_p7, %p3108_p6 }
  0x32   :  { %p3111_p9 = pnand %p3110_p8, %p3104_p5 }
  0x34   :  { %3114 = shalt.err (!%p3111_p9)
}
  0x35   :  { %s3240_s3 = smov 128   ;;  %s3241_s27 = smov 8  }
  0x36   :  { %30 = dma.hbm_to_vmem [thread:$0]  %s3820_s0, 1024, %s25_s26, [#allocation5], %s3240_s3, %s3240_s3, %s3241_s27  }
  0x37   :  { %s3242_s15 = smov [#allocation9]   ;;  %s3115_s19 = scalar_lea.hbm %s3822_s2, 6144 }
  0x38   :  { %s46_s16 = sshll.u32 %s3242_s15, 4  ;;  %p3116_p10 = scmp.ne.s32.totalorder %s3822_s2, %s3115_s19  ;;  %s47_s16 = int_to_ptr.vmem [resolvable:$true] %s46_s16 }
  0x39   :  { %p3119_p11 = scmp.lt.u32.totalorder %s3115_s19, %s3822_s2 }
  0x3b   :  { %p3121_p12 = pnand %p3119_p11, %p3116_p10 }
  0x3d   :  { %3124 = shalt.err (!%p3121_p12)
}
  0x3e   :  { %s3125_s1 = scalar_lea.vmem %s47_s16, 6144  ;;  %p3130_p0 = scmp.lt.s32.totalorder %s47_s16, %s47_s16 }
  0x3f   :  { %p3126_p13 = scmp.ne.s32.totalorder %s47_s16, %s3125_s1  ;;  %p3131_p1 = scmp.lt.s32.totalorder %s3125_s1, %s3125_s1 }
  0x41   :  { %p3132_p2 = por %p3131_p1, %p3130_p0 }
  0x43   :  { %p3133_p3 = pnand %p3132_p2, %p3126_p13 }
  0x45   :  { %3136 = shalt.err (!%p3133_p3)
}
  0x46   :  { %s3243_s0 = smov 384   ;;  %s3244_s24 = smov 24  }
  0x47   :  { %52 = dma.hbm_to_vmem [thread:$0]  %s3822_s2, 6144, %s47_s16, [#allocation8], %s3243_s0, %s3243_s0, %s3244_s24  }
  0x48   :  { %s3245_s28 = smov [#allocation12]   ;;  %s3246_s30 = smov [#allocation13]  }
  0x49   :  { %s68_s29 = sshll.u32 %s3245_s28, 4  ;;  %s81_s8 = sshll.u32 %s3246_s30, 4  ;;  %s69_s29 = int_to_ptr.vmem [resolvable:$true] %s68_s29  ;;  %s82_s8 = int_to_ptr.vmem [resolvable:$true] %s81_s8 }
  0x4a   :  { %s3137_s11 = scalar_lea.hbm %s3824_s4, 6144 }
  0x4b   :  { %p3138_p4 = scmp.ne.s32.totalorder %s3824_s4, %s3137_s11  ;;  %p3141_p5 = scmp.lt.u32.totalorder %s3137_s11, %s3824_s4 }
  0x4d   :  { %p3143_p6 = pnand %p3141_p5, %p3138_p4 }
  0x4f   :  { %3146 = shalt.err (!%p3143_p6)
}
  0x50   :  { %s3147_s2 = scalar_lea.vmem %s69_s29, 6144  ;;  %p3152_p8 = scmp.lt.s32.totalorder %s69_s29, %s69_s29 }
  0x51   :  { %p3148_p7 = scmp.ne.s32.totalorder %s69_s29, %s3147_s2  ;;  %p3153_p9 = scmp.lt.s32.totalorder %s3147_s2, %s3147_s2 }
  0x53   :  { %p3154_p10 = por %p3153_p9, %p3152_p8 }
  0x55   :  { %p3155_p11 = pnand %p3154_p10, %p3148_p7 }
  0x57   :  { %3158 = shalt.err (!%p3155_p11)
}
  0x58   :  { %74 = dma.hbm_to_vmem [thread:$0]  %s3824_s4, 6144, %s69_s29, [#allocation11], %s3243_s0, %s3243_s0, %s3244_s24  }
  0x59   :  { %s3159_s20 = scalar_lea.hbm %s3825_s5, 16 }
  0x5a   :  { %p3160_p12 = scmp.ne.s32.totalorder %s3825_s5, %s3159_s20  ;;  %p3163_p13 = scmp.lt.u32.totalorder %s3159_s20, %s3825_s5 }
  0x5c   :  { %p3165_p0 = pnand %p3163_p13, %p3160_p12 }
  0x5e   :  { %3168 = shalt.err (!%p3165_p0)
}
  0x5f   :  { %s3169_s25 = scalar_lea.vmem %s82_s8, 16  ;;  %s3173_s26 = scalar_lea.vmem %s82_s8, 32 }
  0x60   :  { %p3170_p1 = scmp.ne.s32.totalorder %s82_s8, %s3169_s25  ;;  %p3174_p2 = scmp.lt.s32.totalorder %s82_s8, %s82_s8 }
  0x61   :  { %p3175_p3 = scmp.lt.s32.totalorder %s3173_s26, %s3169_s25 }
  0x63   :  { %p3176_p4 = por %p3175_p3, %p3174_p2 }
  0x65   :  { %p3177_p5 = pnand %p3176_p4, %p3170_p1 }
  0x67   :  { %3180 = shalt.err (!%p3177_p5)
}
  0x68   :  { %84 = dma.hbm_to_vmem [thread:$0]  %s3825_s5, 16, %s82_s8, [#allocation14]  }
  0x69   :  { %3225 = dma.done.wait [#allocation5], 1024  }
  0x6a   :  { %3226 = vsyncadd [#allocation5], 4294966272 }
  0x6b   :  { %3227 = dma.done.wait [#allocation8], 6272  }
  0x6c   :  { %3228 = vsyncadd [#allocation8], 4294961024 }
  0x6d   :  { %3229 = dma.done.wait [#allocation11], 6192  }
  0x6e   :  { %3230 = vsyncadd [#allocation11], 4294961104 }
  0x6f   :  { %3231 = dma.done.wait [#allocation14], 16  }
  0x70   :  { %3232 = vsyncadd [#allocation14], 4294967280  ;;  %v3247_v0 = vmov 0.0   ;;  %v110_v1 = vld [vmem:[#allocation9 + $0x8] sm:$0xff]  ;;  %v113_v2 = vld [vmem:[#allocation9 + $0x20] sm:$0xff]  ;;  %vm3249_vm0 = vmmov 0  }
  0x71   :  { %295 = vmatprep.mubr.f32.mxu0 %v3247_v0  ;;  %v109_v3 = vld [vmem:[#allocation9] sm:$0xff]  ;;  %v2410_v4 = vpack.c.bf16 %v113_v2, %v110_v1  ;;  %v112_v5 = vld [vmem:[#allocation9 + $0x18] sm:$0xff]  ;;  %v119_v7 = vld [vmem:[#allocation9 + $0x50] sm:$0xff]  ;;  %s3250_s5 = smov [#allocation15]   ;;  %s3251_s28 = smov [#allocation16]  }
  0x72   :  { %v116_v6 = vld [vmem:[#allocation9 + $0x38] sm:$0xff]  ;;  %v2412_v8 = vpack.c.bf16 %v112_v5, %v109_v3  ;;  %v115_v10 = vld [vmem:[#allocation9 + $0x30] sm:$0xff]  ;;  %v118_v11 = vld [vmem:[#allocation9 + $0x48] sm:$0xff]  ;;  %s1880_s24 = sshll.u32 %s3250_s5, 4  ;;  %s1893_s29 = sshll.u32 %s3251_s28, 4  ;;  %s1881_s24 = int_to_ptr.vmem [resolvable:$true] %s1880_s24  ;;  %s1894_s29 = int_to_ptr.vmem [resolvable:$true] %s1893_s29 }
  0x73   :  { %v2414_v9 = vpack.c.bf16 %v119_v7, %v116_v6  ;;  %v122_v12 = vld [vmem:[#allocation9 + $0x68] sm:$0xff]  ;;  %2411 = vmatprep.subr.bf16.mxu0 %v2410_v4  ;;  %v125_v13 = vld [vmem:[#allocation9 + $0x80] sm:$0xff]  ;;  %v2416_v14 = vpack.c.bf16 %v118_v11, %v115_v10  ;;  %v124_v17 = vld [vmem:[#allocation9 + $0x78] sm:$0xff]  ;;  %s3181_s30 = scalar_lea.vmem %s1881_s24, 1024  ;;  %p3186_p7 = scmp.lt.s32.totalorder %s1881_s24, %s1881_s24 }
  0x74   :  { %2413 = vmatpush1.bf16.msra.mxu0 %v2412_v8  ;;  %v2418_v15 = vpack.c.bf16 %v125_v13, %v122_v12  ;;  %v121_v16 = vld [vmem:[#allocation9 + $0x60] sm:$0xff]  ;;  %v128_v18 = vld [vmem:[#allocation9 + $0x98] sm:$0xff]  ;;  %v131_v19 = vld [vmem:[#allocation9 + $0xb0] sm:$0xff]  ;;  %p3182_p6 = scmp.ne.s32.totalorder %s1881_s24, %s3181_s30  ;;  %p3187_p8 = scmp.lt.s32.totalorder %s3181_s30, %s3181_s30 }
  0x75   :  { %2415 = vmatprep.subr.bf16.mxu0 %v2414_v9  ;;  %v2420_v20 = vpack.c.bf16 %v124_v17, %v121_v16  ;;  %v127_v21 = vld [vmem:[#allocation9 + $0x90] sm:$0xff]  ;;  %v2422_v22 = vpack.c.bf16 %v131_v19, %v128_v18  ;;  %v130_v23 = vld [vmem:[#allocation9 + $0xa8] sm:$0xff]  ;;  %v137_v27 = vld [vmem:[#allocation9 + $0xe0] sm:$0xff] }
  0x76   :  { %v111_v24 = vld [vmem:[#allocation9 + $0x10] sm:$0xff]  ;;  %v114_v25 = vld [vmem:[#allocation9 + $0x28] sm:$0xff]  ;;  %v117_v29 = vld [vmem:[#allocation9 + $0x40] sm:$0xff]  ;;  %v2424_v31 = vpack.c.bf16 %v130_v23, %v127_v21  ;;  %p3188_p9 = por %p3187_p8, %p3186_p7 }
  0x77   :  { %v134_v26 = vld [vmem:[#allocation9 + $0xc8] sm:$0xff]  ;;  %v2442_v28 = vpack.c.bf16 %v114_v25, %v111_v24  ;;  %v120_v30 = vld [vmem:[#allocation9 + $0x58] sm:$0xff]  ;;  %v133_v32 = vld [vmem:[#allocation9 + $0xc0] sm:$0xff] }
  0x78   :  { %2417 = vmatpush1.bf16.msra.mxu0 %v2416_v14  ;;  %v2446_v33 = vpack.c.bf16 %v120_v30, %v117_v29  ;;  %v2426_v34 = vpack.c.bf16 %v137_v27, %v134_v26  ;;  %v136_v35 = vld [vmem:[#allocation9 + $0xd8] sm:$0xff]  ;;  %v123_v37 = vld [vmem:[#allocation9 + $0x70] sm:$0xff]  ;;  %v126_v40 = vld [vmem:[#allocation9 + $0x88] sm:$0xff]  ;;  %p3189_p10 = pnand %p3188_p9, %p3182_p6 }
  0x79   :  { %2419 = vmatprep.subr.bf16.mxu0 %v2418_v15  ;;  %2443 = vmatprep.subr.bf16.mxu1 %v2442_v28  ;;  %v3368_v36 = vld [vmem:[#allocation4] sm:$0xff]  ;;  %v143_v39 = vld [vmem:[#allocation9 + $0x110] sm:$0xff]  ;;  %v2450_v41 = vpack.c.bf16 %v126_v40, %v123_v37  ;;  %v2428_v42 = vpack.c.bf16 %v136_v35, %v133_v32  ;;  %v129_v43 = vld [vmem:[#allocation9 + $0xa0] sm:$0xff]  ;;  %v3248_v40 = vmov 0.0|0.0  }
  0x7a   :  { %2445 = vmatpush3.bf16.msra.mxu1 %v2442_v28  ;;  %v140_v38 = vld [vmem:[#allocation9 + $0xf8] sm:$0xff]  ;;  %2118 = vmatprep.mubr.f32.mxu1 %v3368_v36  ;;  %v139_v46 = vld [vmem:[#allocation9 + $0xf0] sm:$0xff]  ;;  %v142_v47 = vld [vmem:[#allocation9 + $0x108] sm:$0xff] }
  0x7b   :  { %2447 = vmatprep.subr.bf16.mxu1 %v2446_v33  ;;  %v132_v44 = vld [vmem:[#allocation9 + $0xb8] sm:$0xff]  ;;  %v2430_v45 = vpack.c.bf16 %v143_v39, %v140_v38  ;;  %v146_v48 = vld [vmem:[#allocation9 + $0x128] sm:$0xff]  ;;  %v149_v49 = vld [vmem:[#allocation9 + $0x140] sm:$0xff]  ;;  %v2432_v53 = vpack.c.bf16 %v142_v47, %v139_v46 }
  0x7c   :  { %2421 = vmatpush1.bf16.msra.mxu0 %v2420_v20  ;;  %v2454_v50 = vpack.c.bf16 %v132_v44, %v129_v43  ;;  %v135_v51 = vld [vmem:[#allocation9 + $0xd0] sm:$0xff]  ;;  %v138_v52 = vld [vmem:[#allocation9 + $0xe8] sm:$0xff]  ;;  %v2434_v54 = vpack.c.bf16 %v149_v49, %v146_v48  ;;  %v145_v55 = vld [vmem:[#allocation9 + $0x120] sm:$0xff] }
  0x7d   :  { %2423 = vmatprep.subr.bf16.mxu0 %v2422_v22  ;;  %v148_v56 = vld [vmem:[#allocation9 + $0x138] sm:$0xff]  ;;  %v155_v58 = vld [vmem:[#allocation9 + $0x170] sm:$0xff]  ;;  %v2458_v59 = vpack.c.bf16 %v138_v52, %v135_v51  ;;  %v141_v60 = vld [vmem:[#allocation9 + $0x100] sm:$0xff] }
  0x7e   :  { %2449 = vmatpush3.bf16.msra.mxu1 %v2446_v33  ;;  %v152_v57 = vld [vmem:[#allocation9 + $0x158] sm:$0xff]  ;;  %v2436_v62 = vpack.c.bf16 %v148_v56, %v145_v55  ;;  %v151_v1 = vld [vmem:[#allocation9 + $0x150] sm:$0xff]  ;;  %v154_v2 = vld [vmem:[#allocation9 + $0x168] sm:$0xff] }
  0x7f   :  { %2451 = vmatprep.subr.bf16.mxu1 %v2450_v41  ;;  %v144_v61 = vld [vmem:[#allocation9 + $0x118] sm:$0xff]  ;;  %v2438_v63 = vpack.c.bf16 %v155_v58, %v152_v57  ;;  %v158_v3 = vld [vmem:[#allocation12 + $0x8] sm:$0xff]  ;;  %v161_v4 = vld [vmem:[#allocation12 + $0x20] sm:$0xff]  ;;  %v2440_v8 = vpack.c.bf16 %v154_v2, %v151_v1 }
  0x80   :  { %2425 = vmatpush1.bf16.msra.mxu0 %v2424_v31  ;;  %v2462_v5 = vpack.c.bf16 %v144_v61, %v141_v60  ;;  %v147_v6 = vld [vmem:[#allocation9 + $0x130] sm:$0xff]  ;;  %v150_v7 = vld [vmem:[#allocation9 + $0x148] sm:$0xff]  ;;  %v3371_v9 = vpack.c.bf16 %v161_v4, %v158_v3  ;;  %v160_v11 = vld [vmem:[#allocation12 + $0x18] sm:$0xff] }
  0x81   :  { %2427 = vmatprep.subr.bf16.mxu0 %v2426_v34  ;;  %v157_v10 = vld [vmem:[#allocation12] sm:$0xff]  ;;  %v164_v12 = vld [vmem:[#allocation12 + $0x38] sm:$0xff]  ;;  %v167_v13 = vld [vmem:[#allocation12 + $0x50] sm:$0xff]  ;;  %v2466_v14 = vpack.c.bf16 %v150_v7, %v147_v6 }
  0x82   :  { %2453 = vmatpush3.bf16.msra.mxu1 %v2450_v41  ;;  %v153_v15 = vld [vmem:[#allocation9 + $0x160] sm:$0xff]  ;;  %v156_v16 = vld [vmem:[#allocation9 + $0x178] sm:$0xff]  ;;  %v3373_v17 = vpack.c.bf16 %v160_v11, %v157_v10  ;;  %v3376_v18 = vpack.c.bf16 %v167_v13, %v164_v12  ;;  %v166_v20 = vld [vmem:[#allocation12 + $0x48] sm:$0xff] }
  0x83   :  { %2455 = vmatprep.subr.bf16.mxu1 %v2454_v50  ;;  %v163_v19 = vld [vmem:[#allocation12 + $0x30] sm:$0xff]  ;;  %v170_v21 = vld [vmem:[#allocation12 + $0x68] sm:$0xff]  ;;  %v173_v22 = vld [vmem:[#allocation12 + $0x80] sm:$0xff]  ;;  %v2470_v23 = vpack.c.bf16 %v156_v16, %v153_v15 }
  0x84   :  { %2429 = vmatpush1.bf16.msra.mxu0 %v2428_v42  ;;  %v208_v24 = vld [vmem:[#allocation4 + $0x8] sm:$0xff]  ;;  %v3381_v25 = vpack.c.bf16 %v166_v20, %v163_v19  ;;  %v3384_v26 = vpack.c.bf16 %v173_v22, %v170_v21  ;;  %v179_v30 = vld [vmem:[#allocation12 + $0xb0] sm:$0xff]  ;;  %v162_v32 = vld [vmem:[#allocation12 + $0x28] sm:$0xff] }
  0x85   :  { %2431 = vmatprep.subr.bf16.mxu0 %v2430_v45  ;;  %v169_v27 = vld [vmem:[#allocation12 + $0x60] sm:$0xff]  ;;  %v172_v28 = vld [vmem:[#allocation12 + $0x78] sm:$0xff]  ;;  %v159_v31 = vld [vmem:[#allocation12 + $0x10] sm:$0xff] }
  0x86   :  { %2457 = vmatpush3.bf16.msra.mxu1 %v2454_v50  ;;  %v176_v29 = vld [vmem:[#allocation12 + $0x98] sm:$0xff]  ;;  %v209_v33 = vld [vmem:[#allocation4 + $0x10] sm:$0xff]  ;;  %v3388_v34 = vpack.c.bf16 %v172_v28, %v169_v27  ;;  %v3394_v41 = vpack.c.bf16 %v162_v32, %v159_v31  ;;  %v210_v44 = vld [vmem:[#allocation4 + $0x18] sm:$0xff] }
  0x87   :  { %2459 = vmatprep.subr.bf16.mxu1 %v2458_v59  ;;  %v3391_v35 = vpack.c.bf16 %v179_v30, %v176_v29  ;;  %v178_v37 = vld [vmem:[#allocation12 + $0xa8] sm:$0xff]  ;;  %v185_v39 = vld [vmem:[#allocation12 + $0xe0] sm:$0xff]  ;;  %v168_v43 = vld [vmem:[#allocation12 + $0x58] sm:$0xff] }
  0x88   :  { %2433 = vmatpush1.bf16.msra.mxu0 %v2432_v53  ;;  %v182_v38 = vld [vmem:[#allocation12 + $0xc8] sm:$0xff]  ;;  %v165_v42 = vld [vmem:[#allocation12 + $0x40] sm:$0xff]  ;;  %v184_v48 = vld [vmem:[#allocation12 + $0xd8] sm:$0xff] }
  0x89   :  { %2435 = vmatprep.subr.bf16.mxu0 %v2434_v54  ;;  %v3401_v46 = vpack.c.bf16 %v185_v39, %v182_v38  ;;  %v181_v47 = vld [vmem:[#allocation12 + $0xc0] sm:$0xff]  ;;  %v188_v49 = vld [vmem:[#allocation12 + $0xf8] sm:$0xff]  ;;  %v191_v50 = vld [vmem:[#allocation12 + $0x110] sm:$0xff]  ;;  %v3404_v51 = vpack.c.bf16 %v168_v43, %v165_v42 }
  0x8a   :  { %2461 = vmatpush3.bf16.msra.mxu1 %v2458_v59  ;;  %v171_v52 = vld [vmem:[#allocation12 + $0x70] sm:$0xff]  ;;  %v174_v53 = vld [vmem:[#allocation12 + $0x88] sm:$0xff]  ;;  %v3409_v55 = vpack.c.bf16 %v184_v48, %v181_v47  ;;  %v3412_v56 = vpack.c.bf16 %v191_v50, %v188_v49  ;;  %v197_v60 = vld [vmem:[#allocation12 + $0x140] sm:$0xff] }
  0x8b   :  { %2463 = vmatprep.subr.bf16.mxu1 %v2462_v5  ;;  %v211_v54 = vld [vmem:[#allocation4 + $0x20] sm:$0xff]  ;;  %v190_v58 = vld [vmem:[#allocation12 + $0x108] sm:$0xff]  ;;  %v3415_v61 = vpack.c.bf16 %v174_v53, %v171_v52  ;;  %v212_v1 = vld [vmem:[#allocation4 + $0x28] sm:$0xff] }
  0x8c   :  { %2437 = vmatpush1.bf16.msra.mxu0 %v2436_v62  ;;  %v187_v57 = vld [vmem:[#allocation12 + $0xf0] sm:$0xff]  ;;  %v194_v59 = vld [vmem:[#allocation12 + $0x128] sm:$0xff]  ;;  %v177_v62 = vld [vmem:[#allocation12 + $0xa0] sm:$0xff] }
  0x8d   :  { %2439 = vmatprep.subr.bf16.mxu0 %v2438_v63  ;;  %v180_v63 = vld [vmem:[#allocation12 + $0xb8] sm:$0xff]  ;;  %v3420_v2 = vpack.c.bf16 %v190_v58, %v187_v57  ;;  %v213_v3 = vld [vmem:[#allocation4 + $0x30] sm:$0xff]  ;;  %v3423_v4 = vpack.c.bf16 %v197_v60, %v194_v59  ;;  %v183_v11 = vld [vmem:[#allocation12 + $0xd0] sm:$0xff] }
  0x8e   :  { %2465 = vmatpush3.bf16.msra.mxu1 %v2462_v5  ;;  %v193_v5 = vld [vmem:[#allocation12 + $0x120] sm:$0xff]  ;;  %v196_v6 = vld [vmem:[#allocation12 + $0x138] sm:$0xff]  ;;  %v3426_v10 = vpack.c.bf16 %v180_v63, %v177_v62  ;;  %v186_v12 = vld [vmem:[#allocation12 + $0xe8] sm:$0xff] }
  0x8f   :  { %2467 = vmatprep.subr.bf16.mxu1 %v2466_v14  ;;  %v200_v7 = vld [vmem:[#allocation12 + $0x158] sm:$0xff]  ;;  %v3431_v13 = vpack.c.bf16 %v196_v6, %v193_v5  ;;  %v199_v16 = vld [vmem:[#allocation12 + $0x150] sm:$0xff]  ;;  %v202_v19 = vld [vmem:[#allocation12 + $0x168] sm:$0xff]  ;;  %v3437_v20 = vpack.c.bf16 %v186_v12, %v183_v11 }
  0x90   :  { %2441 = vmatpush1.bf16.msra.mxu0 %v2440_v8  ;;  %v203_v8 = vld [vmem:[#allocation12 + $0x170] sm:$0xff]  ;;  %v189_v21 = vld [vmem:[#allocation12 + $0x100] sm:$0xff]  ;;  %v192_v22 = vld [vmem:[#allocation12 + $0x118] sm:$0xff] }
  0x91   :  { %2475 = vmatprep.subr.bf16.mxu0 %v3371_v9  ;;  %v3434_v15 = vpack.c.bf16 %v203_v8, %v200_v7  ;;  %v195_v27 = vld [vmem:[#allocation12 + $0x130] sm:$0xff]  ;;  %v198_v28 = vld [vmem:[#allocation12 + $0x148] sm:$0xff]  ;;  %v201_v31 = vld [vmem:[#allocation12 + $0x160] sm:$0xff] }
  0x92   :  { %2469 = vmatpush3.bf16.msra.mxu1 %v2466_v14  ;;  %v214_v14 = vld [vmem:[#allocation4 + $0x38] sm:$0xff]  ;;  %v3453_v29 = vld [vmem:[#allocation7] sm:$0xff]  ;;  %v3457_v30 = vpack.c.bf16 %v198_v28, %v195_v27  ;;  %v205_v39 = vld [vmem:[#allocation10] sm:$0x7] }
  0x93   :  { %296 = vmatmul.mubr.f32.vlgmr.msra.gmra.mrb[0].mxu0 %v3368_v36  ;;  %2471 = vmatprep.subr.bf16.mxu1 %v2470_v23  ;;  %v175_v36 = vld [vmem:[#allocation12 + $0x90] sm:$0xff]  ;;  %v204_v32 = vld [vmem:[#allocation12 + $0x178] sm:$0xff]  ;;  %v3523_v28 = vld [vmem:[#allocation13] ss:$0 sm:$0xff] }
  0x94   :  { %2477 = vmatpush1.bf16.msra.mxu0 %v3373_v17  ;;  %301 = vmatprep.mubr.f32.mxu0 %v3247_v0  ;;  %v3398_v45 = vpack.c.bf16 %v178_v37, %v175_v36  ;;  %v216_v36 = vlaneseq }
  0x95   :  { %2479 = vmatprep.subr.bf16.mxu0 %v3376_v18 }
  0x96   :  { %2473 = vmatpush3.bf16.msra.mxu1 %v2470_v23  ;;  %v3444_v23 = vpack.c.bf16 %v202_v19, %v199_v16  ;;  %v217_v37 = vshrl.u32 %v216_v36, 7 }
  0x97   :  { %302 = vmatmul.mubr.f32.gmra.mrb[2].mxu0 %v208_v24  ;;  %2506 = vmatprep.subr.bf16.mxu1 %v3248_v40 }
  0x98   :  { %2481 = vmatpush1.bf16.msra.mxu0 %v3381_v25  ;;  %307 = vmatprep.mubr.f32.mxu0 %v3247_v0  ;;  %v226_v38 = vsub.s32 2, %v217_v37  ;;  %v222_v7 = vsub.s32 1, %v217_v37 }
  0x99   :  { %2483 = vmatprep.subr.bf16.mxu0 %v3384_v26  ;;  %2119 = vmatmul.mubr.f32.vlgmr.msra.gmra.mrb[0].mxu1 %v208_v24  ;;  %v3448_v24 = vpack.c.bf16 %v192_v22, %v189_v21 }
  0x9a   :  { %2508 = vmatpush3.bf16.msra.mxu1 %v3394_v41  ;;  %2121 = vmatprep.mubr.f32.mxu1 %v209_v33  ;;  %v227_v42 = vrot.slane %v205_v39, %v226_v38  ;;  %v3520_v12 = vrot.slane %v205_v39, %v222_v7 }
  0x9b   :  { %308 = vmatmul.mubr.f32.gmra.mrb[4].mxu0 %v209_v33  ;;  %2509 = vmatprep.subr.bf16.mxu1 %v3248_v40  ;;  %v3465_v33 = vpack.c.bf16 %v204_v32, %v201_v31 }
  0x9c   :  { %2485 = vmatpush1.bf16.msra.mxu0 %v3388_v34  ;;  %313 = vmatprep.mubr.f32.mxu0 %v3247_v0 }
  0x9d   :  { %2487 = vmatprep.subr.bf16.mxu0 %v3391_v35  ;;  %2122 = vmatmul.mubr.f32.gmra.mrb[2].mxu1 %v210_v44 }
  0x9e   :  { %2511 = vmatpush3.bf16.msra.mxu1 %v3404_v51  ;;  %2124 = vmatprep.mubr.f32.mxu1 %v211_v54 }
  0x9f   :  { %314 = vmatmul.mubr.f32.gmra.mrb[6].mxu0 %v210_v44  ;;  %2512 = vmatprep.subr.bf16.mxu1 %v3248_v40 }
  0xa0   :  { %2489 = vmatpush1.bf16.msra.mxu0 %v3398_v45  ;;  %319 = vmatprep.mubr.f32.mxu0 %v3247_v0 }
  0xa1   :  { %2491 = vmatprep.subr.bf16.mxu0 %v3401_v46  ;;  %2125 = vmatmul.mubr.f32.gmra.mrb[4].mxu1 %v212_v1 }
  0xa2   :  { %2514 = vmatpush3.bf16.msra.mxu1 %v3415_v61  ;;  %2127 = vmatprep.mubr.f32.mxu1 %v213_v3 }
  0xa3   :  { %320 = vmatmul.mubr.f32.gmra.mrb[8].mxu0 %v211_v54  ;;  %2515 = vmatprep.subr.bf16.mxu1 %v3248_v40 }
  0xa4   :  { %2493 = vmatpush1.bf16.msra.mxu0 %v3409_v55  ;;  %325 = vmatprep.mubr.f32.mxu0 %v3247_v0 }
  0xa5   :  { %2495 = vmatprep.subr.bf16.mxu0 %v3412_v56  ;;  %2128 = vmatmul.mubr.f32.gmra.mrb[6].mxu1 %v214_v14 }
  0xa6   :  { %2517 = vmatpush3.bf16.msra.mxu1 %v3426_v10  ;;  %2162 = vmatprep.mubr.msk.f32.mxu1 %vm3249_vm0, %v3247_v0 }
  0xa7   :  { %326 = vmatmul.mubr.f32.gmra.mrb[10].mxu0 %v212_v1  ;;  %2518 = vmatprep.subr.bf16.mxu1 %v3248_v40  ;;  %v218_v1 = vsub.s32 0, %v217_v37 }
  0xa8   :  { %2497 = vmatpush1.bf16.msra.mxu0 %v3420_v2  ;;  %331 = vmatprep.mubr.f32.mxu0 %v3247_v0 }
  0xa9   :  { %2499 = vmatprep.subr.bf16.mxu0 %v3423_v4 }
  0xaa   :  { %2520 = vmatpush3.bf16.msra.mxu1 %v3437_v20 }
  0xab   :  { %332 = vmatmul.mubr.f32.gmra.mrb[12].mxu0 %v213_v3  ;;  %2521 = vmatprep.subr.bf16.mxu1 %v3248_v40  ;;  %v3517_v3 = vrot.slane %v205_v39, %v218_v1 }
  0xac   :  { %2501 = vmatpush1.bf16.msra.mxu0 %v3431_v13  ;;  %337 = vmatprep.mubr.f32.mxu0 %v3247_v0 }
  0xad   :  { %2503 = vmatprep.subr.bf16.mxu0 %v3434_v15 }
  0xae   :  { %2523 = vmatpush3.bf16.msra.mxu1 %v3448_v24 }
  0xaf   :  { %338 = vmatmul.mubr.f32.gmra.mrb[14].mxu0 %v214_v14  ;;  %2524 = vmatprep.subr.bf16.mxu1 %v3248_v40 }
  0xb0   :  { %2505 = vmatpush1.bf16.msra.mxu0 %v3444_v23  ;;  %539 = vmatprep.mubr.f32.mxu0 %v3247_v0 }
  0xb1   :  { %2531 = vmatprep.subr.bf16.mxu0 %v3371_v9 }
  0xb2   :  { %2526 = vmatpush3.bf16.msra.mxu1 %v3457_v30 }
  0xb3   :  { %540 = vmatmul.mubr.f32.vlgmr.msra.gmra.mrb[0].mxu0 %v3453_v29  ;;  %2527 = vmatprep.subr.bf16.mxu1 %v3248_v40 }
  0xb4   :  { %2533 = vmatpush1.bf16.msra.mxu0 %v3373_v17  ;;  %716 = vmatprep.mubr.f32.mxu0 %v3247_v0 }
  0xb5   :  { %2535 = vmatprep.subr.bf16.mxu0 %v3376_v18 }
  0xb6   :  { %2529 = vmatpush3.bf16.msra.mxu1 %v3465_v33 }
  0xb7   :  { %2562 = vmatprep.subr.bf16.mxu1 %v3248_v40 }
  0xb8   :  { %2537 = vmatpush1.bf16.msra.mxu0 %v3381_v25 }
  0xb9   :  { %2539 = vmatprep.subr.bf16.mxu0 %v3384_v26  ;;  %2163 = vmatmul.mubr.f32.vlgmr.msra.gmra.mrb[8].mxu1 %v3453_v29 }
  0xba   :  { %2564 = vmatpush3.bf16.msra.mxu1 %v3394_v41  ;;  %2197 = vmatprep.mubr.msk.f32.mxu1 %vm3249_vm0, %v3247_v0 }
  0xbb   :  { %2565 = vmatprep.subr.bf16.mxu1 %v3248_v40 }
  0xbc   :  { %2541 = vmatpush1.bf16.msra.mxu0 %v3388_v34 }
  0xbd   :  { %2543 = vmatprep.subr.bf16.mxu0 %v3391_v35 }
  0xbe   :  { %2567 = vmatpush3.bf16.msra.mxu1 %v3404_v51 }
  0xbf   :  { %2568 = vmatprep.subr.bf16.mxu1 %v3248_v40 }
  0xc0   :  { %2545 = vmatpush1.bf16.msra.mxu0 %v3398_v45 }
  0xc1   :  { %2547 = vmatprep.subr.bf16.mxu0 %v3401_v46 }
  0xc2   :  { %2570 = vmatpush3.bf16.msra.mxu1 %v3415_v61 }
  0xc3   :  { %2571 = vmatprep.subr.bf16.mxu1 %v3248_v40 }
  0xc4   :  { %2549 = vmatpush1.bf16.msra.mxu0 %v3409_v55 }
  0xc5   :  { %2551 = vmatprep.subr.bf16.mxu0 %v3412_v56 }
  0xc6   :  { %2573 = vmatpush3.bf16.msra.mxu1 %v3426_v10 }
  0xc7   :  { %2574 = vmatprep.subr.bf16.mxu1 %v3248_v40 }
  0xc8   :  { %2553 = vmatpush1.bf16.msra.mxu0 %v3420_v2 }
  0xc9   :  { %2555 = vmatprep.subr.bf16.mxu0 %v3423_v4 }
  0xca   :  { %2576 = vmatpush3.bf16.msra.mxu1 %v3437_v20 }
  0xcb   :  { %2577 = vmatprep.subr.bf16.mxu1 %v3248_v40 }
  0xcc   :  { %2557 = vmatpush1.bf16.msra.mxu0 %v3431_v13 }
  0xcd   :  { %2559 = vmatprep.subr.bf16.mxu0 %v3434_v15 }
  0xce   :  { %2579 = vmatpush3.bf16.msra.mxu1 %v3448_v24 }
  0xcf   :  { %2580 = vmatprep.subr.bf16.mxu1 %v3248_v40 }
  0xd0   :  { %2561 = vmatpush1.bf16.msra.mxu0 %v3444_v23 }
  0xd1   :  { %2587 = vmatprep.subr.bf16.mxu0 %v3371_v9 }
  0xd2   :  { %2582 = vmatpush3.bf16.msra.mxu1 %v3457_v30 }
  0xd3   :  { %2583 = vmatprep.subr.bf16.mxu1 %v3248_v40 }
  0xd6   :  { %2585 = vmatpush3.bf16.msra.mxu1 %v3465_v33 }
  0xd7   :  { %2618 = vmatprep.subr.bf16.mxu1 %v3248_v40 }
 0x16c   :  { %v2120_v43 = vpop.f32.mrb[0].mxu1 }
 0x16d   :  { %v3503_v44 = vadd.f32 %v2120_v43, %v227_v42  ;;  %v410_v47 = vpop.f32.mrb[1].mxu1 }
 0x16e   :  { %v411_v37 = vadd.f32 %v410_v47, %v227_v42 }
 0x170   :  { %v2123_v48 = vpop.f32.mrb[2].mxu1 }
 0x171   :  { %v3505_v49 = vadd.f32 %v2123_v48, %v227_v42  ;;  %v420_v50 = vpop.f32.mrb[3].mxu1 }
 0x172   :  { %v3507_v52 = vadd.f32 %v420_v50, %v227_v42 }
 0x174   :  { %v2126_v53 = vpop.f32.mrb[4].mxu1 }
 0x175   :  { %v3509_v54 = vadd.f32 %v2126_v53, %v227_v42  ;;  %v430_v57 = vpop.f32.mrb[5].mxu1 }
 0x176   :  { %v3511_v58 = vadd.f32 %v430_v57, %v227_v42 }
 0x178   :  { %v2129_v59 = vpop.f32.mrb[6].mxu1 }
 0x179   :  { %v3513_v60 = vadd.f32 %v2129_v59, %v227_v42  ;;  %v440_v62 = vpop.f32.mrb[7].mxu1 }
 0x17a   :  { %v3515_v63 = vadd.f32 %v440_v62, %v227_v42 }
 0x186   :  { %v541_v5 = vpop.f32.mrb[0].mxu0 }
 0x187   :  { %v2922_v6 = vadd.f32 %v541_v5, %v3517_v3  ;;  %v543_v8 = vpop.f32.mrb[1].mxu0 }
 0x188   :  { %v2923_v14 = vadd.f32 %v543_v8, %v3520_v12 }
 0x189   :  { %v1909_v11 = vmul.f32 -1.442695, %v2922_v6 }
 0x18a   :  { %v1910_v21 = vmul.f32 -1.442695, %v2923_v14 }
 0x18b   :  { %2969 = vpow2.f32 %v1909_v11 }
 0x18c   :  { %v612_v16 = vpop.f32.mrb[8].mxu1  ;;  %2971 = vpow2.f32 %v1910_v21 }
 0x18d   :  { %v2164_v19 = vpop.f32.mrb[9].mxu1  ;;  %v639_v31 = vadd.f32 %v3523_v28, %v612_v16 }
 0x195   :  { %v2970_v22 = vpop.eup %2969 }
 0x196   :  { %v623_v27 = vadd.f32 1.0, %v2970_v22  ;;  %v2972_v32 = vpop.eup %2971 }
 0x197   :  { %v630_v43 = vadd.f32 1.0, %v2972_v32 }
 0x198   :  { %2973 = vrcp.f32 %v623_v27 }
 0x1a2   :  { %v2974_v36 = vpop.eup %2973 }
 0x1a3   :  { %v640_v38 = vmul.f32 %v2974_v36, %v639_v31 }
 0x1a5   :  { %v641_v39 = vadd.f32 %v640_v38, %v411_v37 }
 0x1a7   :  { %2975 = vtanh.f32 %v641_v39 }
 0x1a8   :  { %2977 = vrcp.f32 %v630_v43 }
 0x1b1   :  { %v2976_v48 = vpop.eup %2975 }
 0x1b2   :  { %v643_v50 = vsub.f32 %v3453_v29, %v2976_v48  ;;  %v2978_v53 = vpop.eup %2977 }
 0x1b4   :  { %v644_v57 = vmul.f32 %v2978_v53, %v643_v50 }
 0x1b6   :  { %v3527_v59 = vadd.f32 %v2976_v48, %v644_v57 }
 0x1b8   :  { %651 = vst [vmem:[#allocation15] sm:$0xff] %v3527_v59  ;;  %717 = vmatmul.mubr.f32.vlgmr.msra.gmra.mrb[2].mxu0 %v3527_v59  ;;  %2198 = vmatmul.mubr.f32.vlgmr.msra.gmra.mrb[10].mxu1 %v3527_v59 }
 0x1b9   :  { %2589 = vmatpush1.bf16.msra.mxu0 %v3373_v17  ;;  %2620 = vmatpush3.bf16.msra.mxu1 %v3394_v41 }
 0x1ba   :  { %2591 = vmatprep.subr.bf16.mxu0 %v3376_v18  ;;  %2621 = vmatprep.subr.bf16.mxu1 %v3248_v40 }
 0x1bb   :  { %890 = vmatprep.mubr.f32.mxu0 %v3247_v0  ;;  %2232 = vmatprep.mubr.msk.f32.mxu1 %vm3249_vm0, %v3247_v0 }
 0x1bd   :  { %2593 = vmatpush1.bf16.msra.mxu0 %v3381_v25  ;;  %2623 = vmatpush3.bf16.msra.mxu1 %v3404_v51 }
 0x1be   :  { %2595 = vmatprep.subr.bf16.mxu0 %v3384_v26  ;;  %2624 = vmatprep.subr.bf16.mxu1 %v3248_v40 }
 0x1c1   :  { %2597 = vmatpush1.bf16.msra.mxu0 %v3388_v34  ;;  %2626 = vmatpush3.bf16.msra.mxu1 %v3415_v61 }
 0x1c2   :  { %2599 = vmatprep.subr.bf16.mxu0 %v3391_v35  ;;  %2627 = vmatprep.subr.bf16.mxu1 %v3248_v40 }
 0x1c5   :  { %2601 = vmatpush1.bf16.msra.mxu0 %v3398_v45  ;;  %2629 = vmatpush3.bf16.msra.mxu1 %v3426_v10 }
 0x1c6   :  { %2603 = vmatprep.subr.bf16.mxu0 %v3401_v46  ;;  %2630 = vmatprep.subr.bf16.mxu1 %v3248_v40 }
 0x1c9   :  { %2605 = vmatpush1.bf16.msra.mxu0 %v3409_v55  ;;  %2632 = vmatpush3.bf16.msra.mxu1 %v3437_v20 }
 0x1ca   :  { %2607 = vmatprep.subr.bf16.mxu0 %v3412_v56  ;;  %2633 = vmatprep.subr.bf16.mxu1 %v3248_v40 }
 0x1cd   :  { %2609 = vmatpush1.bf16.msra.mxu0 %v3420_v2  ;;  %2635 = vmatpush3.bf16.msra.mxu1 %v3448_v24 }
 0x1ce   :  { %2611 = vmatprep.subr.bf16.mxu0 %v3423_v4  ;;  %2636 = vmatprep.subr.bf16.mxu1 %v3248_v40 }
 0x1d1   :  { %2613 = vmatpush1.bf16.msra.mxu0 %v3431_v13  ;;  %2638 = vmatpush3.bf16.msra.mxu1 %v3457_v30 }
 0x1d2   :  { %2615 = vmatprep.subr.bf16.mxu0 %v3434_v15  ;;  %2639 = vmatprep.subr.bf16.mxu1 %v3248_v40 }
 0x1d5   :  { %2617 = vmatpush1.bf16.msra.mxu0 %v3444_v23  ;;  %2641 = vmatpush3.bf16.msra.mxu1 %v3465_v33 }
 0x1d6   :  { %2643 = vmatprep.subr.bf16.mxu0 %v3371_v9  ;;  %2674 = vmatprep.subr.bf16.mxu1 %v3248_v40 }
 0x28b   :  { %v718_v29 = vpop.f32.mrb[2].mxu0  ;;  %v789_v42 = vpop.f32.mrb[10].mxu1 }
 0x28c   :  { %v2924_v47 = vadd.f32 %v718_v29, %v3517_v3  ;;  %v720_v62 = vpop.f32.mrb[3].mxu0  ;;  %v2199_v1 = vpop.f32.mrb[11].mxu1  ;;  %v811_v16 = vadd.f32 %v3523_v28, %v789_v42 }
 0x28d   :  { %v2925_v6 = vadd.f32 %v720_v62, %v3520_v12 }
 0x28e   :  { %v1912_v5 = vmul.f32 -1.442695, %v2924_v47 }
 0x28f   :  { %v1913_v7 = vmul.f32 -1.442695, %v2925_v6 }
 0x290   :  { %2979 = vpow2.f32 %v1912_v5 }
 0x291   :  { %2981 = vpow2.f32 %v1913_v7 }
 0x29a   :  { %v2980_v8 = vpop.eup %2979 }
 0x29b   :  { %v801_v11 = vadd.f32 1.0, %v2980_v8  ;;  %v2982_v14 = vpop.eup %2981 }
 0x29c   :  { %v808_v27 = vadd.f32 1.0, %v2982_v14 }
 0x29d   :  { %2983 = vrcp.f32 %v801_v11 }
 0x2a7   :  { %v2984_v19 = vpop.eup %2983 }
 0x2a8   :  { %v812_v21 = vmul.f32 %v2984_v19, %v811_v16 }
 0x2aa   :  { %v813_v22 = vadd.f32 %v812_v21, %v3503_v44 }
 0x2ac   :  { %2985 = vtanh.f32 %v813_v22 }
 0x2ad   :  { %2987 = vrcp.f32 %v808_v27 }
 0x2b6   :  { %v2986_v31 = vpop.eup %2985 }
 0x2b7   :  { %v815_v32 = vsub.f32 %v3527_v59, %v2986_v31  ;;  %v2988_v36 = vpop.eup %2987 }
 0x2b9   :  { %v816_v37 = vmul.f32 %v2988_v36, %v815_v32 }
 0x2bb   :  { %v3572_v38 = vadd.f32 %v2986_v31, %v816_v37 }
 0x2bd   :  { %825 = vst [vmem:[#allocation15 + $0x8] sm:$0xff] %v3572_v38  ;;  %891 = vmatmul.mubr.f32.vlgmr.msra.gmra.mrb[4].mxu0 %v3572_v38  ;;  %2233 = vmatmul.mubr.f32.vlgmr.msra.gmra.mrb[12].mxu1 %v3572_v38 }
 0x2be   :  { %2645 = vmatpush1.bf16.msra.mxu0 %v3373_v17  ;;  %2676 = vmatpush3.bf16.msra.mxu1 %v3394_v41 }
 0x2bf   :  { %2647 = vmatprep.subr.bf16.mxu0 %v3376_v18  ;;  %2677 = vmatprep.subr.bf16.mxu1 %v3248_v40 }
 0x2c0   :  { %1064 = vmatprep.mubr.f32.mxu0 %v3247_v0  ;;  %2267 = vmatprep.mubr.msk.f32.mxu1 %vm3249_vm0, %v3247_v0 }
 0x2c2   :  { %2649 = vmatpush1.bf16.msra.mxu0 %v3381_v25  ;;  %2679 = vmatpush3.bf16.msra.mxu1 %v3404_v51 }
 0x2c3   :  { %2651 = vmatprep.subr.bf16.mxu0 %v3384_v26  ;;  %2680 = vmatprep.subr.bf16.mxu1 %v3248_v40 }
 0x2c6   :  { %2653 = vmatpush1.bf16.msra.mxu0 %v3388_v34  ;;  %2682 = vmatpush3.bf16.msra.mxu1 %v3415_v61 }
 0x2c7   :  { %2655 = vmatprep.subr.bf16.mxu0 %v3391_v35  ;;  %2683 = vmatprep.subr.bf16.mxu1 %v3248_v40 }
 0x2ca   :  { %2657 = vmatpush1.bf16.msra.mxu0 %v3398_v45  ;;  %2685 = vmatpush3.bf16.msra.mxu1 %v3426_v10 }
 0x2cb   :  { %2659 = vmatprep.subr.bf16.mxu0 %v3401_v46  ;;  %2686 = vmatprep.subr.bf16.mxu1 %v3248_v40 }
 0x2ce   :  { %2661 = vmatpush1.bf16.msra.mxu0 %v3409_v55  ;;  %2688 = vmatpush3.bf16.msra.mxu1 %v3437_v20 }
 0x2cf   :  { %2663 = vmatprep.subr.bf16.mxu0 %v3412_v56  ;;  %2689 = vmatprep.subr.bf16.mxu1 %v3248_v40 }
 0x2d2   :  { %2665 = vmatpush1.bf16.msra.mxu0 %v3420_v2  ;;  %2691 = vmatpush3.bf16.msra.mxu1 %v3448_v24 }
 0x2d3   :  { %2667 = vmatprep.subr.bf16.mxu0 %v3423_v4  ;;  %2692 = vmatprep.subr.bf16.mxu1 %v3248_v40 }
 0x2d6   :  { %2669 = vmatpush1.bf16.msra.mxu0 %v3431_v13  ;;  %2694 = vmatpush3.bf16.msra.mxu1 %v3457_v30 }
 0x2d7   :  { %2671 = vmatprep.subr.bf16.mxu0 %v3434_v15  ;;  %2695 = vmatprep.subr.bf16.mxu1 %v3248_v40 }
 0x2da   :  { %2673 = vmatpush1.bf16.msra.mxu0 %v3444_v23  ;;  %2697 = vmatpush3.bf16.msra.mxu1 %v3465_v33 }
 0x2db   :  { %2699 = vmatprep.subr.bf16.mxu0 %v3371_v9  ;;  %2730 = vmatprep.subr.bf16.mxu1 %v3248_v40 }
 0x390   :  { %v892_v44 = vpop.f32.mrb[4].mxu0  ;;  %v963_v43 = vpop.f32.mrb[12].mxu1 }
 0x391   :  { %v2926_v39 = vadd.f32 %v892_v44, %v3517_v3  ;;  %v894_v48 = vpop.f32.mrb[5].mxu0  ;;  %v2234_v50 = vpop.f32.mrb[13].mxu1  ;;  %v985_v62 = vadd.f32 %v3523_v28, %v963_v43 }
 0x392   :  { %v2927_v57 = vadd.f32 %v894_v48, %v3520_v12 }
 0x393   :  { %v1914_v53 = vmul.f32 -1.442695, %v2926_v39 }
 0x394   :  { %v1915_v59 = vmul.f32 -1.442695, %v2927_v57 }
 0x395   :  { %2989 = vpow2.f32 %v1914_v53 }
 0x396   :  { %2991 = vpow2.f32 %v1915_v59 }
 0x39f   :  { %v2990_v29 = vpop.eup %2989 }
 0x3a0   :  { %v975_v42 = vadd.f32 1.0, %v2990_v29  ;;  %v2992_v47 = vpop.eup %2991 }
 0x3a1   :  { %v982_v7 = vadd.f32 1.0, %v2992_v47 }
 0x3a2   :  { %2993 = vrcp.f32 %v975_v42 }
 0x3ac   :  { %v2994_v1 = vpop.eup %2993 }
 0x3ad   :  { %v986_v5 = vmul.f32 %v2994_v1, %v985_v62 }
 0x3af   :  { %v987_v6 = vadd.f32 %v986_v5, %v3507_v52 }
 0x3b1   :  { %2995 = vtanh.f32 %v987_v6 }
 0x3b2   :  { %2997 = vrcp.f32 %v982_v7 }
 0x3bb   :  { %v2996_v8 = vpop.eup %2995 }
 0x3bc   :  { %v989_v11 = vsub.f32 %v3572_v38, %v2996_v8  ;;  %v2998_v14 = vpop.eup %2997 }
 0x3be   :  { %v990_v16 = vmul.f32 %v2998_v14, %v989_v11 }
 0x3c0   :  { %v3617_v19 = vadd.f32 %v2996_v8, %v990_v16 }
 0x3c2   :  { %999 = vst [vmem:[#allocation15 + $0x10] sm:$0xff] %v3617_v19  ;;  %1065 = vmatmul.mubr.f32.vlgmr.msra.gmra.mrb[6].mxu0 %v3617_v19  ;;  %2268 = vmatmul.mubr.f32.vlgmr.msra.gmra.mrb[14].mxu1 %v3617_v19 }
 0x3c3   :  { %2701 = vmatpush1.bf16.msra.mxu0 %v3373_v17  ;;  %2732 = vmatpush3.bf16.msra.mxu1 %v3394_v41 }
 0x3c4   :  { %2703 = vmatprep.subr.bf16.mxu0 %v3376_v18  ;;  %2733 = vmatprep.subr.bf16.mxu1 %v3248_v40 }
 0x3c5   :  { %1238 = vmatprep.mubr.f32.mxu0 %v3247_v0  ;;  %2302 = vmatprep.mubr.msk.f32.mxu1 %vm3249_vm0, %v3247_v0 }
 0x3c7   :  { %2705 = vmatpush1.bf16.msra.mxu0 %v3381_v25  ;;  %2735 = vmatpush3.bf16.msra.mxu1 %v3404_v51 }
 0x3c8   :  { %2707 = vmatprep.subr.bf16.mxu0 %v3384_v26  ;;  %2736 = vmatprep.subr.bf16.mxu1 %v3248_v40 }
 0x3cb   :  { %2709 = vmatpush1.bf16.msra.mxu0 %v3388_v34  ;;  %2738 = vmatpush3.bf16.msra.mxu1 %v3415_v61 }
 0x3cc   :  { %2711 = vmatprep.subr.bf16.mxu0 %v3391_v35  ;;  %2739 = vmatprep.subr.bf16.mxu1 %v3248_v40 }
 0x3cf   :  { %2713 = vmatpush1.bf16.msra.mxu0 %v3398_v45  ;;  %2741 = vmatpush3.bf16.msra.mxu1 %v3426_v10 }
 0x3d0   :  { %2715 = vmatprep.subr.bf16.mxu0 %v3401_v46  ;;  %2742 = vmatprep.subr.bf16.mxu1 %v3248_v40 }
 0x3d3   :  { %2717 = vmatpush1.bf16.msra.mxu0 %v3409_v55  ;;  %2744 = vmatpush3.bf16.msra.mxu1 %v3437_v20 }
 0x3d4   :  { %2719 = vmatprep.subr.bf16.mxu0 %v3412_v56  ;;  %2745 = vmatprep.subr.bf16.mxu1 %v3248_v40 }
 0x3d7   :  { %2721 = vmatpush1.bf16.msra.mxu0 %v3420_v2  ;;  %2747 = vmatpush3.bf16.msra.mxu1 %v3448_v24 }
 0x3d8   :  { %2723 = vmatprep.subr.bf16.mxu0 %v3423_v4  ;;  %2748 = vmatprep.subr.bf16.mxu1 %v3248_v40 }
 0x3db   :  { %2725 = vmatpush1.bf16.msra.mxu0 %v3431_v13  ;;  %2750 = vmatpush3.bf16.msra.mxu1 %v3457_v30 }
 0x3dc   :  { %2727 = vmatprep.subr.bf16.mxu0 %v3434_v15  ;;  %2751 = vmatprep.subr.bf16.mxu1 %v3248_v40 }
 0x3df   :  { %2729 = vmatpush1.bf16.msra.mxu0 %v3444_v23  ;;  %2753 = vmatpush3.bf16.msra.mxu1 %v3465_v33 }
 0x3e0   :  { %2755 = vmatprep.subr.bf16.mxu0 %v3371_v9  ;;  %2786 = vmatprep.subr.bf16.mxu1 %v3248_v40 }
 0x495   :  { %v1066_v52 = vpop.f32.mrb[6].mxu0  ;;  %v1137_v21 = vpop.f32.mrb[14].mxu1 }
 0x496   :  { %v2928_v22 = vadd.f32 %v1066_v52, %v3517_v3  ;;  %v1068_v27 = vpop.f32.mrb[7].mxu0  ;;  %v2269_v31 = vpop.f32.mrb[15].mxu1  ;;  %v1159_v39 = vadd.f32 %v3523_v28, %v1137_v21 }
 0x497   :  { %v2929_v36 = vadd.f32 %v1068_v27, %v3520_v12 }
 0x498   :  { %v1916_v32 = vmul.f32 -1.442695, %v2928_v22 }
 0x499   :  { %v1917_v37 = vmul.f32 -1.442695, %v2929_v36 }
 0x49a   :  { %2999 = vpow2.f32 %v1916_v32 }
 0x49b   :  { %3001 = vpow2.f32 %v1917_v37 }
 0x4a4   :  { %v3000_v38 = vpop.eup %2999 }
 0x4a5   :  { %v1149_v44 = vadd.f32 1.0, %v3000_v38  ;;  %v3002_v43 = vpop.eup %3001 }
 0x4a6   :  { %v1156_v57 = vadd.f32 1.0, %v3002_v43 }
 0x4a7   :  { %3003 = vrcp.f32 %v1149_v44 }
 0x4b1   :  { %v3004_v48 = vpop.eup %3003 }
 0x4b2   :  { %v1160_v50 = vmul.f32 %v3004_v48, %v1159_v39 }
 0x4b4   :  { %v1161_v53 = vadd.f32 %v1160_v50, %v3505_v49 }
 0x4b6   :  { %3005 = vtanh.f32 %v1161_v53 }
 0x4b7   :  { %3007 = vrcp.f32 %v1156_v57 }
 0x4c0   :  { %v3006_v59 = vpop.eup %3005 }
 0x4c1   :  { %v1163_v29 = vsub.f32 %v3617_v19, %v3006_v59  ;;  %v3008_v42 = vpop.eup %3007 }
 0x4c3   :  { %v1164_v47 = vmul.f32 %v3008_v42, %v1163_v29 }
 0x4c5   :  { %v3662_v62 = vadd.f32 %v3006_v59, %v1164_v47 }
 0x4c7   :  { %1173 = vst [vmem:[#allocation15 + $0x18] sm:$0xff] %v3662_v62  ;;  %1239 = vmatmul.mubr.f32.vlgmr.msra.gmra.mrb[8].mxu0 %v3662_v62  ;;  %2303 = vmatmul.mubr.f32.vlgmr.msra.gmra.mrb[16].mxu1 %v3662_v62 }
 0x4c8   :  { %2757 = vmatpush1.bf16.msra.mxu0 %v3373_v17  ;;  %2788 = vmatpush3.bf16.msra.mxu1 %v3394_v41 }
 0x4c9   :  { %2759 = vmatprep.subr.bf16.mxu0 %v3376_v18  ;;  %2789 = vmatprep.subr.bf16.mxu1 %v3248_v40 }
 0x4ca   :  { %1412 = vmatprep.mubr.f32.mxu0 %v3247_v0  ;;  %2337 = vmatprep.mubr.msk.f32.mxu1 %vm3249_vm0, %v3247_v0 }
 0x4cc   :  { %2761 = vmatpush1.bf16.msra.mxu0 %v3381_v25  ;;  %2791 = vmatpush3.bf16.msra.mxu1 %v3404_v51 }
 0x4cd   :  { %2763 = vmatprep.subr.bf16.mxu0 %v3384_v26  ;;  %2792 = vmatprep.subr.bf16.mxu1 %v3248_v40 }
 0x4d0   :  { %2765 = vmatpush1.bf16.msra.mxu0 %v3388_v34  ;;  %2794 = vmatpush3.bf16.msra.mxu1 %v3415_v61 }
 0x4d1   :  { %2767 = vmatprep.subr.bf16.mxu0 %v3391_v35  ;;  %2795 = vmatprep.subr.bf16.mxu1 %v3248_v40 }
 0x4d4   :  { %2769 = vmatpush1.bf16.msra.mxu0 %v3398_v45  ;;  %2797 = vmatpush3.bf16.msra.mxu1 %v3426_v10 }
 0x4d5   :  { %2771 = vmatprep.subr.bf16.mxu0 %v3401_v46  ;;  %2798 = vmatprep.subr.bf16.mxu1 %v3248_v40 }
 0x4d8   :  { %2773 = vmatpush1.bf16.msra.mxu0 %v3409_v55  ;;  %2800 = vmatpush3.bf16.msra.mxu1 %v3437_v20 }
 0x4d9   :  { %2775 = vmatprep.subr.bf16.mxu0 %v3412_v56  ;;  %2801 = vmatprep.subr.bf16.mxu1 %v3248_v40 }
 0x4dc   :  { %2777 = vmatpush1.bf16.msra.mxu0 %v3420_v2  ;;  %2803 = vmatpush3.bf16.msra.mxu1 %v3448_v24 }
 0x4dd   :  { %2779 = vmatprep.subr.bf16.mxu0 %v3423_v4  ;;  %2804 = vmatprep.subr.bf16.mxu1 %v3248_v40 }
 0x4e0   :  { %2781 = vmatpush1.bf16.msra.mxu0 %v3431_v13  ;;  %2806 = vmatpush3.bf16.msra.mxu1 %v3457_v30 }
 0x4e1   :  { %2783 = vmatprep.subr.bf16.mxu0 %v3434_v15  ;;  %2807 = vmatprep.subr.bf16.mxu1 %v3248_v40 }
 0x4e4   :  { %2785 = vmatpush1.bf16.msra.mxu0 %v3444_v23  ;;  %2809 = vmatpush3.bf16.msra.mxu1 %v3465_v33 }
 0x4e5   :  { %2811 = vmatprep.subr.bf16.mxu0 %v3371_v9  ;;  %2842 = vmatprep.subr.bf16.mxu1 %v3248_v40 }
 0x59a   :  { %v1240_v49 = vpop.f32.mrb[8].mxu0  ;;  %v1311_v1 = vpop.f32.mrb[16].mxu1 }
 0x59b   :  { %v2930_v5 = vadd.f32 %v1240_v49, %v3517_v3  ;;  %v1242_v6 = vpop.f32.mrb[9].mxu0  ;;  %v2304_v7 = vpop.f32.mrb[17].mxu1  ;;  %v1333_v21 = vadd.f32 %v3523_v28, %v1311_v1 }
 0x59c   :  { %v2931_v11 = vadd.f32 %v1242_v6, %v3520_v12 }
 0x59d   :  { %v1918_v8 = vmul.f32 -1.442695, %v2930_v5 }
 0x59e   :  { %v1919_v14 = vmul.f32 -1.442695, %v2931_v11 }
 0x59f   :  { %3009 = vpow2.f32 %v1918_v8 }
 0x5a0   :  { %3011 = vpow2.f32 %v1919_v14 }
 0x5a9   :  { %v3010_v16 = vpop.eup %3009 }
 0x5aa   :  { %v1323_v19 = vadd.f32 1.0, %v3010_v16  ;;  %v3012_v52 = vpop.eup %3011 }
 0x5ab   :  { %v1330_v32 = vadd.f32 1.0, %v3012_v52 }
 0x5ac   :  { %3013 = vrcp.f32 %v1323_v19 }
 0x5b6   :  { %v3014_v22 = vpop.eup %3013 }
 0x5b7   :  { %v1334_v27 = vmul.f32 %v3014_v22, %v1333_v21 }
 0x5b9   :  { %v1335_v31 = vadd.f32 %v1334_v27, %v3511_v58 }
 0x5bb   :  { %3015 = vtanh.f32 %v1335_v31 }
 0x5bc   :  { %3017 = vrcp.f32 %v1330_v32 }
 0x5c5   :  { %v3016_v36 = vpop.eup %3015 }
 0x5c6   :  { %v1337_v37 = vsub.f32 %v3662_v62, %v3016_v36  ;;  %v3018_v38 = vpop.eup %3017 }
 0x5c8   :  { %v1338_v44 = vmul.f32 %v3018_v38, %v1337_v37 }
 0x5ca   :  { %v3707_v43 = vadd.f32 %v3016_v36, %v1338_v44 }
 0x5cc   :  { %1347 = vst [vmem:[#allocation15 + $0x20] sm:$0xff] %v3707_v43  ;;  %1413 = vmatmul.mubr.f32.vlgmr.msra.gmra.mrb[10].mxu0 %v3707_v43  ;;  %2338 = vmatmul.mubr.f32.vlgmr.msra.gmra.mrb[18].mxu1 %v3707_v43 }
 0x5cd   :  { %2813 = vmatpush1.bf16.msra.mxu0 %v3373_v17  ;;  %2844 = vmatpush3.bf16.msra.mxu1 %v3394_v41 }
 0x5ce   :  { %2815 = vmatprep.subr.bf16.mxu0 %v3376_v18  ;;  %2845 = vmatprep.subr.bf16.mxu1 %v3248_v40 }
 0x5cf   :  { %1586 = vmatprep.mubr.f32.mxu0 %v3247_v0  ;;  %2372 = vmatprep.mubr.msk.f32.mxu1 %vm3249_vm0, %v3247_v0 }
 0x5d1   :  { %2817 = vmatpush1.bf16.msra.mxu0 %v3381_v25  ;;  %2847 = vmatpush3.bf16.msra.mxu1 %v3404_v51 }
 0x5d2   :  { %2819 = vmatprep.subr.bf16.mxu0 %v3384_v26  ;;  %2848 = vmatprep.subr.bf16.mxu1 %v3248_v40 }
 0x5d5   :  { %2821 = vmatpush1.bf16.msra.mxu0 %v3388_v34  ;;  %2850 = vmatpush3.bf16.msra.mxu1 %v3415_v61 }
 0x5d6   :  { %2823 = vmatprep.subr.bf16.mxu0 %v3391_v35  ;;  %2851 = vmatprep.subr.bf16.mxu1 %v3248_v40 }
 0x5d9   :  { %2825 = vmatpush1.bf16.msra.mxu0 %v3398_v45  ;;  %2853 = vmatpush3.bf16.msra.mxu1 %v3426_v10 }
 0x5da   :  { %2827 = vmatprep.subr.bf16.mxu0 %v3401_v46  ;;  %2854 = vmatprep.subr.bf16.mxu1 %v3248_v40 }
 0x5dd   :  { %2829 = vmatpush1.bf16.msra.mxu0 %v3409_v55  ;;  %2856 = vmatpush3.bf16.msra.mxu1 %v3437_v20 }
 0x5de   :  { %2831 = vmatprep.subr.bf16.mxu0 %v3412_v56  ;;  %2857 = vmatprep.subr.bf16.mxu1 %v3248_v40 }
 0x5e1   :  { %2833 = vmatpush1.bf16.msra.mxu0 %v3420_v2  ;;  %2859 = vmatpush3.bf16.msra.mxu1 %v3448_v24 }
 0x5e2   :  { %2835 = vmatprep.subr.bf16.mxu0 %v3423_v4  ;;  %2860 = vmatprep.subr.bf16.mxu1 %v3248_v40 }
 0x5e5   :  { %2837 = vmatpush1.bf16.msra.mxu0 %v3431_v13  ;;  %2862 = vmatpush3.bf16.msra.mxu1 %v3457_v30 }
 0x5e6   :  { %2839 = vmatprep.subr.bf16.mxu0 %v3434_v15  ;;  %2863 = vmatprep.subr.bf16.mxu1 %v3248_v40 }
 0x5e9   :  { %2841 = vmatpush1.bf16.msra.mxu0 %v3444_v23  ;;  %2865 = vmatpush3.bf16.msra.mxu1 %v3465_v33 }
 0x5ea   :  { %2867 = vmatprep.subr.bf16.mxu0 %v3371_v9  ;;  %2898 = vmatprep.subr.bf16.mxu1 %v3248_v40 }
 0x69f   :  { %v1414_v58 = vpop.f32.mrb[10].mxu0  ;;  %v1485_v39 = vpop.f32.mrb[18].mxu1 }
 0x6a0   :  { %v2932_v48 = vadd.f32 %v1414_v58, %v3517_v3  ;;  %v1416_v50 = vpop.f32.mrb[11].mxu0  ;;  %v2339_v53 = vpop.f32.mrb[19].mxu1  ;;  %v1507_v9 = vadd.f32 %v3523_v28, %v1485_v39 }
 0x6a1   :  { %v2933_v59 = vadd.f32 %v1416_v50, %v3520_v12 }
 0x6a2   :  { %v1920_v57 = vmul.f32 -1.442695, %v2932_v48 }
 0x6a3   :  { %v1921_v29 = vmul.f32 -1.442695, %v2933_v59 }
 0x6a4   :  { %3019 = vpow2.f32 %v1920_v57 }
 0x6a5   :  { %3021 = vpow2.f32 %v1921_v29 }
 0x6ae   :  { %v3020_v42 = vpop.eup %3019 }
 0x6af   :  { %v1497_v47 = vadd.f32 1.0, %v3020_v42  ;;  %v3022_v62 = vpop.eup %3021 }
 0x6b0   :  { %v1504_v6 = vadd.f32 1.0, %v3022_v62 }
 0x6b1   :  { %3023 = vrcp.f32 %v1497_v47 }
 0x6bb   :  { %v3024_v49 = vpop.eup %3023 }
 0x6bc   :  { %v1508_v1 = vmul.f32 %v3024_v49, %v1507_v9 }
 0x6be   :  { %v1509_v5 = vadd.f32 %v1508_v1, %v3509_v54 }
 0x6c0   :  { %3025 = vtanh.f32 %v1509_v5 }
 0x6c1   :  { %3027 = vrcp.f32 %v1504_v6 }
 0x6ca   :  { %v3026_v7 = vpop.eup %3025 }
 0x6cb   :  { %v1511_v8 = vsub.f32 %v3707_v43, %v3026_v7  ;;  %v3028_v11 = vpop.eup %3027 }
 0x6cd   :  { %v1512_v14 = vmul.f32 %v3028_v11, %v1511_v8 }
 0x6cf   :  { %v1513_v16 = vadd.f32 %v3026_v7, %v1512_v14 }
 0x6d1   :  { %1521 = vst [vmem:[#allocation15 + $0x28] sm:$0xff] %v1513_v16  ;;  %1587 = vmatmul.mubr.f32.vlgmr.msra.gmra.mrb[12].mxu0 %v1513_v16  ;;  %2373 = vmatmul.mubr.f32.vlgmr.msra.gmra.mrb[20].mxu1 %v1513_v16 }
 0x6d2   :  { %2869 = vmatpush1.bf16.msra.mxu0 %v3373_v17  ;;  %2900 = vmatpush3.bf16.msra.mxu1 %v3394_v41 }
 0x6d3   :  { %2871 = vmatprep.subr.bf16.mxu0 %v3376_v18  ;;  %2901 = vmatprep.subr.bf16.mxu1 %v3248_v40 }
 0x6d4   :  { %1760 = vmatprep.mubr.f32.mxu0 %v3247_v0  ;;  %2407 = vmatprep.mubr.msk.f32.mxu1 %vm3249_vm0, %v3247_v0 }
 0x6d6   :  { %2873 = vmatpush1.bf16.msra.mxu0 %v3381_v25  ;;  %2903 = vmatpush3.bf16.msra.mxu1 %v3404_v51 }
 0x6d7   :  { %2875 = vmatprep.subr.bf16.mxu0 %v3384_v26  ;;  %2904 = vmatprep.subr.bf16.mxu1 %v3248_v40 }
 0x6da   :  { %2877 = vmatpush1.bf16.msra.mxu0 %v3388_v34  ;;  %2906 = vmatpush3.bf16.msra.mxu1 %v3415_v61 }
 0x6db   :  { %2879 = vmatprep.subr.bf16.mxu0 %v3391_v35  ;;  %2907 = vmatprep.subr.bf16.mxu1 %v3248_v40 }
 0x6de   :  { %2881 = vmatpush1.bf16.msra.mxu0 %v3398_v45  ;;  %2909 = vmatpush3.bf16.msra.mxu1 %v3426_v10 }
 0x6df   :  { %2883 = vmatprep.subr.bf16.mxu0 %v3401_v46  ;;  %2910 = vmatprep.subr.bf16.mxu1 %v3248_v40 }
 0x6e2   :  { %2885 = vmatpush1.bf16.msra.mxu0 %v3409_v55  ;;  %2912 = vmatpush3.bf16.msra.mxu1 %v3437_v20 }
 0x6e3   :  { %2887 = vmatprep.subr.bf16.mxu0 %v3412_v56  ;;  %2913 = vmatprep.subr.bf16.mxu1 %v3248_v40 }
 0x6e6   :  { %2889 = vmatpush1.bf16.msra.mxu0 %v3420_v2  ;;  %2915 = vmatpush3.bf16.msra.mxu1 %v3448_v24 }
 0x6e7   :  { %2891 = vmatprep.subr.bf16.mxu0 %v3423_v4  ;;  %2916 = vmatprep.subr.bf16.mxu1 %v3248_v40 }
 0x6ea   :  { %2893 = vmatpush1.bf16.msra.mxu0 %v3431_v13  ;;  %2918 = vmatpush3.bf16.msra.mxu1 %v3457_v30 }
 0x6eb   :  { %2895 = vmatprep.subr.bf16.mxu0 %v3434_v15  ;;  %2919 = vmatprep.subr.bf16.mxu1 %v3248_v40 }
 0x6ee   :  { %2897 = vmatpush1.bf16.msra.mxu0 %v3444_v23  ;;  %2921 = vmatpush3.bf16.msra.mxu1 %v3465_v33 }
 0x7a4   :  { %v1588_v0 = vpop.f32.mrb[12].mxu0  ;;  %v1659_v17 = vpop.f32.mrb[20].mxu1 }
 0x7a5   :  { %v2934_v18 = vadd.f32 %v1588_v0, %v3517_v3  ;;  %v1590_v25 = vpop.f32.mrb[13].mxu0  ;;  %v2374_v26 = vpop.f32.mrb[21].mxu1  ;;  %v1681_v51 = vadd.f32 %v3523_v28, %v1659_v17 }
 0x7a6   :  { %v2935_v35 = vadd.f32 %v1590_v25, %v3520_v12 }
 0x7a7   :  { %v1922_v34 = vmul.f32 -1.442695, %v2934_v18 }
 0x7a8   :  { %v1923_v41 = vmul.f32 -1.442695, %v2935_v35 }
 0x7a9   :  { %3029 = vpow2.f32 %v1922_v34 }
 0x7aa   :  { %3031 = vpow2.f32 %v1923_v41 }
 0x7b3   :  { %v3030_v45 = vpop.eup %3029 }
 0x7b4   :  { %v1671_v46 = vadd.f32 1.0, %v3030_v45  ;;  %v3032_v40 = vpop.eup %3031 }
 0x7b5   :  { %v1678_v2 = vadd.f32 1.0, %v3032_v40 }
 0x7b6   :  { %3033 = vrcp.f32 %v1671_v46 }
 0x7c0   :  { %v3034_v55 = vpop.eup %3033 }
 0x7c1   :  { %v1682_v56 = vmul.f32 %v3034_v55, %v1681_v51 }
 0x7c3   :  { %v1683_v61 = vadd.f32 %v1682_v56, %v3515_v63 }
 0x7c5   :  { %3035 = vtanh.f32 %v1683_v61 }
 0x7c6   :  { %3037 = vrcp.f32 %v1678_v2 }
 0x7cf   :  { %v3036_v4 = vpop.eup %3035 }
 0x7d0   :  { %v1685_v10 = vsub.f32 %v1513_v16, %v3036_v4  ;;  %v3038_v13 = vpop.eup %3037 }
 0x7d2   :  { %v1686_v15 = vmul.f32 %v3038_v13, %v1685_v10 }
 0x7d4   :  { %v1687_v20 = vadd.f32 %v3036_v4, %v1686_v15 }
 0x7d6   :  { %1695 = vst [vmem:[#allocation15 + $0x30] sm:$0xff] %v1687_v20  ;;  %1761 = vmatmul.mubr.f32.vlgmr.msra.gmra.mrb[14].mxu0 %v1687_v20  ;;  %2408 = vmatmul.mubr.f32.vlgmr.msra.gmra.mrb[22].mxu1 %v1687_v20 }
 0x8a9   :  { %v1762_v23 = vpop.f32.mrb[14].mxu0  ;;  %v1833_v24 = vpop.f32.mrb[22].mxu1 }
 0x8aa   :  { %v2936_v30 = vadd.f32 %v1762_v23, %v3517_v3  ;;  %v1764_v33 = vpop.f32.mrb[15].mxu0  ;;  %v2409_v54 = vpop.f32.mrb[23].mxu1  ;;  %v1855_v31 = vadd.f32 %v3523_v28, %v1833_v24 }
 0x8ab   :  { %v2937_v63 = vadd.f32 %v1764_v33, %v3520_v12 }
 0x8ac   :  { %v1924_v19 = vmul.f32 -1.442695, %v2936_v30 }
 0x8ad   :  { %v1925_v52 = vmul.f32 -1.442695, %v2937_v63 }
 0x8ae   :  { %3039 = vpow2.f32 %v1924_v19 }
 0x8af   :  { %3041 = vpow2.f32 %v1925_v52 }
 0x8b8   :  { %v3040_v21 = vpop.eup %3039 }
 0x8b9   :  { %v1845_v22 = vadd.f32 1.0, %v3040_v21  ;;  %v3042_v27 = vpop.eup %3041 }
 0x8ba   :  { %v1852_v38 = vadd.f32 1.0, %v3042_v27 }
 0x8bb   :  { %3043 = vrcp.f32 %v1845_v22 }
 0x8c5   :  { %v3044_v32 = vpop.eup %3043 }
 0x8c6   :  { %v1856_v36 = vmul.f32 %v3044_v32, %v1855_v31 }
 0x8c8   :  { %v1857_v37 = vadd.f32 %v1856_v36, %v3513_v60 }
 0x8ca   :  { %3045 = vtanh.f32 %v1857_v37 }
 0x8cb   :  { %3047 = vrcp.f32 %v1852_v38 }
 0x8d4   :  { %v3046_v3 = vpop.eup %3045 }
 0x8d5   :  { %v1859_v44 = vsub.f32 %v1687_v20, %v3046_v3  ;;  %v3048_v43 = vpop.eup %3047 }
 0x8d7   :  { %v1860_v12 = vmul.f32 %v3048_v43, %v1859_v44 }
 0x8d9   :  { %v1861_v58 = vadd.f32 %v3046_v3, %v1860_v12 }
 0x8db   :  { %1869 = vst [vmem:[#allocation15 + $0x38] sm:$0xff] %v1861_v58  ;;  %1874 = vst [vmem:[#allocation16] sm:$0xff] %v1861_v58 }
 0x8dc   :  { %3192 = shalt.err (!%p3189_p10)
}
 0x8dd   :  { %s3193_s10 = scalar_lea.hbm %s3826_s6, 1024 }
 0x8de   :  { %p3194_p11 = scmp.ne.s32.totalorder %s3826_s6, %s3193_s10  ;;  %p3197_p12 = scmp.lt.u32.totalorder %s3193_s10, %s3826_s6 }
 0x8e0   :  { %p3199_p13 = pnand %p3197_p12, %p3194_p11 }
 0x8e2   :  { %3202 = shalt.err (!%p3199_p13)
}
 0x8e3   :  { %1886 = dma.vmem_to_hbm [thread:$0]  %s1881_s24, 1024, %s3826_s6, [#allocation6], %s3240_s3, %s3240_s3, %s3241_s27  }
 0x8e4   :  { %s3203_s16 = scalar_lea.vmem %s1894_s29, 128  ;;  %p3208_p1 = scmp.lt.s32.totalorder %s1894_s29, %s1894_s29 }
 0x8e5   :  { %p3204_p0 = scmp.ne.s32.totalorder %s1894_s29, %s3203_s16  ;;  %p3209_p2 = scmp.lt.s32.totalorder %s3203_s16, %s3203_s16 }
 0x8e7   :  { %p3210_p3 = por %p3209_p2, %p3208_p1 }
 0x8e9   :  { %p3211_p4 = pnand %p3210_p3, %p3204_p0 }
 0x8eb   :  { %3214 = shalt.err (!%p3211_p4)
}
 0x8ec   :  { %s3215_s19 = scalar_lea.hbm %s3827_s7, 128 }
 0x8ed   :  { %p3216_p5 = scmp.ne.s32.totalorder %s3827_s7, %s3215_s19  ;;  %p3219_p6 = scmp.lt.u32.totalorder %s3215_s19, %s3827_s7 }
 0x8ef   :  { %p3221_p7 = pnand %p3219_p6, %p3216_p5 }
 0x8f1   :  { %3224 = shalt.err (!%p3221_p7)
}
 0x8f2   :  { %1896 = dma.vmem_to_hbm [thread:$0]  %s1894_s29, 128, %s3827_s7, [#allocation17]  }
 0x8f3   :  { %3233 = dma.done.wait [#allocation6], 1024  }
 0x8f4   :  { %3234 = vsyncadd [#allocation6], 4294966272 }
 0x8f5   :  { %3235 = dma.done.wait [#allocation17], 128  }
 0x8f6   :  { %3236 = vsyncadd [#allocation17], 4294967168 }
 0x8f7   :  { %1903 = vsyncpa [#allocation5], 1 }
 0x8f8   :  { %1904 = vsyncpa [#allocation8], 1 }
 0x8f9   :  { %1905 = vsyncpa [#allocation11], 1 }
 0x8fa   :  { %1906 = vsyncpa [#allocation14], 1 }
 0x8fb   :  { %1907 = vsyncpa [#allocation6], 1 }
 0x8fc   :  { %1908 = vsyncpa [#allocation17], 1 }

</bundles_post_ra>
